<compile_context>
chip_gen: v7x
topology: tpu7x:2x2x1
jax: 0.10.0
libtpu: 0.0.40
codegen_flags: <defaults>
</compile_context>

<pallas_src>
import math

import jax
import jax.numpy as jnp
from jax.experimental import pallas as pl
from jax.experimental.pallas import tpu as pltpu

# ----------------------------- config (small, deterministic) ----------------
BATCH = 2
SEQ = 8
HIDDEN = 32
VOCAB = 64
VOCAB_PAD = 128                    # lane-dense padded vocab for the kernel output
NUM_HEADS = 4
HEAD_DIM = HIDDEN // NUM_HEADS
FFN_DIM = 64
NUM_LAYERS = 2
LN_EPS = 1e-5
QKV_PAD = 128                      # lane-dense padded 3*HIDDEN (=96) QKV output


# ----------------------------- in-kernel helpers ----------------------------
def _layer_norm(x, gamma, beta, eps=LN_EPS):
    # single-pass: mean and mean-of-squares together, var = E[x^2] - mu^2
    mu = jnp.mean(x, axis=-1, keepdims=True)
    ms = jnp.mean(x * x, axis=-1, keepdims=True)
    var = ms - mu * mu
    return (x - mu) * jax.lax.rsqrt(var + eps) * gamma + beta


def _qkt(q, k):
    # q @ k^T without materializing an explicit transpose
    return jax.lax.dot_general(q, k, (((1,), (1,)), ((), ())),
                               preferred_element_type=jnp.float32)


# ----------------------------- fused transformer kernel ---------------------
def fused_transformer_kernel(x_ref,
                             wqkv_ref, bqkv_ref, wo_ref, bo_ref,
                             g1_ref, be1_ref,
                             w1_ref, bf1_ref, w2_ref, bf2_ref,
                             g2_ref, be2_ref,
                             decw_ref, decb_ref,
                             out_ref):
    S, H, hd = SEQ, NUM_HEADS, HEAD_DIM
    scale = 1.0 / math.sqrt(hd)

    x = x_ref[...]                                   # (S, D): one sequence per grid step

    # causal mask for this sequence (hoisted out of the layer loop)
    row = jax.lax.broadcasted_iota(jnp.int32, (S, S), 0)
    col = jax.lax.broadcasted_iota(jnp.int32, (S, S), 1)
    mask = row >= col
    neg_inf = jnp.float32(-1e30)

    for li in range(NUM_LAYERS):                     # static unrolled layer loop
        # ---- fused QKV: one (S, D) x (D, 128) matmul, lane-dense output ----
        qkv = jnp.dot(x, wqkv_ref[li],
                      preferred_element_type=jnp.float32) + bqkv_ref[li]   # (S, 128)

        # ---- per-head masked softmax(QK^T) V (static lane slices of qkv) ---
        ctx_heads = []
        for h in range(H):
            qh = qkv[:, h * hd:(h + 1) * hd]                         # (S, hd)
            kh = qkv[:, HIDDEN + h * hd:HIDDEN + (h + 1) * hd]       # (S, hd)
            vh = qkv[:, 2 * HIDDEN + h * hd:2 * HIDDEN + (h + 1) * hd]
            s = _qkt(qh, kh) * scale                                 # (S, S)
            s = jnp.where(mask, s, neg_inf)
            s = s - jnp.max(s, axis=-1, keepdims=True)
            p = jnp.exp(s)
            p = p * pl.reciprocal(jnp.sum(p, axis=-1, keepdims=True))
            ctx_heads.append(jnp.dot(p, vh,
                                     preferred_element_type=jnp.float32))   # (S, hd)
        ctx = jnp.concatenate(ctx_heads, axis=-1)                    # (S, D)

        # ---- output projection: single (S, D) x (D, D) matmul --------------
        attn = jnp.dot(ctx, wo_ref[li],
                       preferred_element_type=jnp.float32) + bo_ref[li]

        # residual + LayerNorm (post-LN, PyTorch-style)
        h1 = _layer_norm(x + attn, g1_ref[li], be1_ref[li])

        # FFN
        f = jnp.dot(h1, w1_ref[li], preferred_element_type=jnp.float32) + bf1_ref[li]
        f = jnp.maximum(f, 0.0)
        f = jnp.dot(f, w2_ref[li], preferred_element_type=jnp.float32) + bf2_ref[li]

        x = _layer_norm(h1 + f, g2_ref[li], be2_ref[li])

    # ---- final vocab projection; padded to 128 lanes -> unmasked store -----
    out_ref[...] = (jnp.dot(x, decw_ref[...],
                            preferred_element_type=jnp.float32) + decb_ref[...])


# ----------------------------- wrapper ---------------------------------------
def _full_spec(shape):
    n = len(shape)
    return pl.BlockSpec(shape, lambda b, _n=n: (0,) * _n)


@jax.jit
def transformer_lm_forward(input_ids, params):
    # TODO(synk): AdaptiveInput (clustered adaptive embeddings) simplified to a
    # single full embedding table; PositionalEmbedding is sinusoidal. Embedding
    # gather stays in plain JAX (data-dependent gather, no clean Pallas win here).
    B, S = input_ids.shape
    tok = jnp.take(params["tok_embedding"], input_ids, axis=0)       # (B, S, D)
    pos = params["pos_embedding"][None, :S, :]                       # (1, S, D)
    x = (tok + pos).reshape(B * S, HIDDEN)                           # (B*S, D)

    weight_names = ["wqkv", "bqkv", "wo", "bo",
                    "g1", "be1", "w1", "bf1", "w2", "bf2", "g2", "be2",
                    "dec_w", "dec_b"]
    weight_args = [params[n] for n in weight_names]
    weight_specs = [_full_spec(params[n].shape) for n in weight_names]

    logits_pad = pl.pallas_call(
        fused_transformer_kernel,
        out_shape=jax.ShapeDtypeStruct((B * S, VOCAB_PAD), jnp.float32),
        grid=(B,),                                                   # one sequence per step
        in_specs=[pl.BlockSpec((SEQ, HIDDEN), lambda b: (b, 0))] + weight_specs,
        out_specs=pl.BlockSpec((SEQ, VOCAB_PAD), lambda b: (b, 0)),
        compiler_params=pltpu.CompilerParams(
            dimension_semantics=("parallel",)),                      # megacore-friendly
    )(x, *weight_args)

    return logits_pad.reshape(B, S, VOCAB_PAD)[:, :, :VOCAB]


# ----------------------------- embeddings (glue) ----------------------------
def sinusoidal_pos_embedding(seq_len, dim):
    pos = jnp.arange(seq_len, dtype=jnp.float32)[:, None]
    i = jnp.arange(dim // 2, dtype=jnp.float32)[None, :]
    angle = pos / jnp.power(10000.0, (2.0 * i) / dim)
    pe = jnp.zeros((seq_len, dim), dtype=jnp.float32)
    pe = pe.at[:, 0::2].set(jnp.sin(angle))
    pe = pe.at[:, 1::2].set(jnp.cos(angle))
    return pe


# ----------------------------- parameter init + packing ---------------------
def init_params(key):
    def dense(k, fan_in, fan_out):
        lim = 1.0 / math.sqrt(fan_in)
        return jax.random.uniform(k, (fan_in, fan_out), jnp.float32, -lim, lim)

    keys = jax.random.split(key, 2 + NUM_LAYERS)

    params = {}
    params["tok_embedding"] = (
        jax.random.normal(keys[0], (VOCAB, HIDDEN), jnp.float32) * 0.02)
    params["pos_embedding"] = sinusoidal_pos_embedding(SEQ, HIDDEN)

    # vocab projection, zero-padded to 128 lanes (sliced back in the wrapper)
    dec_w = dense(keys[1], HIDDEN, VOCAB)
    dec_b = jnp.zeros((1, VOCAB), jnp.float32)
    params["dec_w"] = jnp.pad(dec_w, ((0, 0), (0, VOCAB_PAD - VOCAB)))
    params["dec_b"] = jnp.pad(dec_b, ((0, 0), (0, VOCAB_PAD - VOCAB)))

    wqkv_l, bqkv_l, wo_l, bo_l = [], [], [], []
    g1_l, be1_l, w1_l, bf1_l, w2_l, bf2_l, g2_l, be2_l = ([] for _ in range(8))
    for li in range(NUM_LAYERS):
        lk = jax.random.split(keys[2 + li], 6)
        wq = dense(lk[0], HIDDEN, HIDDEN)
        wk = dense(lk[1], HIDDEN, HIDDEN)
        wv = dense(lk[2], HIDDEN, HIDDEN)
        wo = dense(lk[3], HIDDEN, HIDDEN)

        wqkv = jnp.concatenate([wq, wk, wv], axis=1)                 # (D, 3D) = (32, 96)
        bqkv = jnp.zeros((1, 3 * HIDDEN), jnp.float32)
        wqkv_l.append(jnp.pad(wqkv, ((0, 0), (0, QKV_PAD - 3 * HIDDEN))))   # (D, 128)
        bqkv_l.append(jnp.pad(bqkv, ((0, 0), (0, QKV_PAD - 3 * HIDDEN))))   # (1, 128)
        wo_l.append(wo)                                              # (D, D)
        bo_l.append(jnp.zeros((1, HIDDEN), jnp.float32))
        g1_l.append(jnp.ones((1, HIDDEN), jnp.float32))
        be1_l.append(jnp.zeros((1, HIDDEN), jnp.float32))
        w1_l.append(dense(lk[4], HIDDEN, FFN_DIM))
        bf1_l.append(jnp.zeros((1, FFN_DIM), jnp.float32))
        w2_l.append(dense(lk[5], FFN_DIM, HIDDEN))
        bf2_l.append(jnp.zeros((1, HIDDEN), jnp.float32))
        g2_l.append(jnp.ones((1, HIDDEN), jnp.float32))
        be2_l.append(jnp.zeros((1, HIDDEN), jnp.float32))

    stack = lambda xs: jnp.stack(xs, axis=0)   # leading layer axis
    params.update(dict(
        wqkv=stack(wqkv_l), bqkv=stack(bqkv_l), wo=stack(wo_l), bo=stack(bo_l),
        g1=stack(g1_l), be1=stack(be1_l), w1=stack(w1_l), bf1=stack(bf1_l),
        w2=stack(w2_l), bf2=stack(bf2_l), g2=stack(g2_l), be2=stack(be2_l),
    ))
    return params


# ----------------------------- main ------------------------------------------
if __name__ == "__main__":
    key = jax.random.PRNGKey(0)
    k_ids, k_params = jax.random.split(key)

    input_ids = jax.random.randint(k_ids, (BATCH, SEQ), 0, VOCAB, dtype=jnp.int32)
    params = init_params(k_params)

    logits = transformer_lm_forward(input_ids, params)
    logits = jax.block_until_ready(logits)

    assert logits.shape == (BATCH, SEQ, VOCAB), logits.shape
    assert jnp.all(jnp.isfinite(logits))
    print("KERNEL_OK")
</pallas_src>

<mosaic_0001>
module attributes {stable_mosaic.version = 11 : i64} {
  func.func @fused_transformer_kernel(%arg0: i32, %arg1: memref<8x32xf32, #tpu.memory_space<vmem>>, %arg2: memref<2x32x128xf32, #tpu.memory_space<vmem>>, %arg3: memref<2x1x128xf32, #tpu.memory_space<vmem>>, %arg4: memref<2x32x32xf32, #tpu.memory_space<vmem>>, %arg5: memref<2x1x32xf32, #tpu.memory_space<vmem>>, %arg6: memref<2x1x32xf32, #tpu.memory_space<vmem>>, %arg7: memref<2x1x32xf32, #tpu.memory_space<vmem>>, %arg8: memref<2x32x64xf32, #tpu.memory_space<vmem>>, %arg9: memref<2x1x64xf32, #tpu.memory_space<vmem>>, %arg10: memref<2x64x32xf32, #tpu.memory_space<vmem>>, %arg11: memref<2x1x32xf32, #tpu.memory_space<vmem>>, %arg12: memref<2x1x32xf32, #tpu.memory_space<vmem>>, %arg13: memref<2x1x32xf32, #tpu.memory_space<vmem>>, %arg14: memref<32x128xf32, #tpu.memory_space<vmem>>, %arg15: memref<1x128xf32, #tpu.memory_space<vmem>>, %arg16: memref<8x128xf32, #tpu.memory_space<vmem>>) attributes {dimension_semantics = [#tpu.dimension_semantics<parallel>], iteration_bounds = array<i64: 2>, scalar_prefetch = 0 : i64, scratch_operands = 0 : i64, tpu.core_type = #tpu.core_type<tc>, window_params = [{transform_indices = @transform_0, window_bounds = array<i64: 8, 32>}, {pipeline_mode = #tpu.pipeline_mode<synchronous>, transform_indices = @transform_1, window_bounds = array<i64: 2, 32, 128>}, {pipeline_mode = #tpu.pipeline_mode<synchronous>, transform_indices = @transform_2, window_bounds = array<i64: 2, 1, 128>}, {pipeline_mode = #tpu.pipeline_mode<synchronous>, transform_indices = @transform_3, window_bounds = array<i64: 2, 32, 32>}, {pipeline_mode = #tpu.pipeline_mode<synchronous>, transform_indices = @transform_4, window_bounds = array<i64: 2, 1, 32>}, {pipeline_mode = #tpu.pipeline_mode<synchronous>, transform_indices = @transform_5, window_bounds = array<i64: 2, 1, 32>}, {pipeline_mode = #tpu.pipeline_mode<synchronous>, transform_indices = @transform_6, window_bounds = array<i64: 2, 1, 32>}, {pipeline_mode = #tpu.pipeline_mode<synchronous>, transform_indices = @transform_7, window_bounds = array<i64: 2, 32, 64>}, {pipeline_mode = #tpu.pipeline_mode<synchronous>, transform_indices = @transform_8, window_bounds = array<i64: 2, 1, 64>}, {pipeline_mode = #tpu.pipeline_mode<synchronous>, transform_indices = @transform_9, window_bounds = array<i64: 2, 64, 32>}, {pipeline_mode = #tpu.pipeline_mode<synchronous>, transform_indices = @transform_10, window_bounds = array<i64: 2, 1, 32>}, {pipeline_mode = #tpu.pipeline_mode<synchronous>, transform_indices = @transform_11, window_bounds = array<i64: 2, 1, 32>}, {pipeline_mode = #tpu.pipeline_mode<synchronous>, transform_indices = @transform_12, window_bounds = array<i64: 2, 1, 32>}, {pipeline_mode = #tpu.pipeline_mode<synchronous>, transform_indices = @transform_13, window_bounds = array<i64: 32, 128>}, {pipeline_mode = #tpu.pipeline_mode<synchronous>, transform_indices = @transform_14, window_bounds = array<i64: 1, 128>}, {transform_indices = @transform_15, window_bounds = array<i64: 8, 128>}]} {
    %c0 = arith.constant 0 : index
    %c0_0 = arith.constant 0 : index
    %0 = vector.load %arg1[%c0, %c0_0] : memref<8x32xf32, #tpu.memory_space<vmem>>, vector<8x32xf32>
    %1 = tpu.iota {dimensions = array<i32: 0>} : vector<8x8xi32>
    %2 = tpu.iota {dimensions = array<i32: 1>} : vector<8x8xi32>
    %3 = arith.cmpi sge, %1, %2 : vector<8x8xi32>
    %c0_1 = arith.constant 0 : index
    %c0_2 = arith.constant 0 : index
    %c0_3 = arith.constant 0 : index
    %4 = vector.load %arg2[%c0_1, %c0_2, %c0_3] : memref<2x32x128xf32, #tpu.memory_space<vmem>>, vector<1x32x128xf32>
    %5 = vector.shape_cast %4 : vector<1x32x128xf32> to vector<32x128xf32>
    %cst = arith.constant dense<0.000000e+00> : vector<8x128xf32>
    %6 = tpu.matmul %0, %5, %cst {dimension_numbers = #tpu.dot_dimension_numbers<[1], [0], [0], [1], [0, 0, 1, 1], [], []>} : vector<8x32xf32>, vector<32x128xf32>, vector<8x128xf32> -> vector<8x128xf32>
    %c0_4 = arith.constant 0 : index
    %c0_5 = arith.constant 0 : index
    %c0_6 = arith.constant 0 : index
    %7 = vector.load %arg3[%c0_4, %c0_5, %c0_6] : memref<2x1x128xf32, #tpu.memory_space<vmem>>, vector<1x1x128xf32>
    %8 = vector.shape_cast %7 : vector<1x1x128xf32> to vector<1x128xf32>
    %9 = vector.broadcast %8 : vector<1x128xf32> to vector<8x128xf32>
    %10 = arith.addf %6, %9 : vector<8x128xf32>
    %11 = vector.extract_strided_slice %10 {offsets = [0, 0], sizes = [8, 8], strides = [1, 1]} : vector<8x128xf32> to vector<8x8xf32>
    %12 = vector.extract_strided_slice %10 {offsets = [0, 32], sizes = [8, 8], strides = [1, 1]} : vector<8x128xf32> to vector<8x8xf32>
    %13 = vector.extract_strided_slice %10 {offsets = [0, 64], sizes = [8, 8], strides = [1, 1]} : vector<8x128xf32> to vector<8x8xf32>
    %cst_7 = arith.constant dense<0.000000e+00> : vector<8x8xf32>
    %14 = tpu.matmul %11, %12, %cst_7 {dimension_numbers = #tpu.dot_dimension_numbers<[1], [1], [0], [0], [0, 0, 1, 0], [], []>} : vector<8x8xf32>, vector<8x8xf32>, vector<8x8xf32> -> vector<8x8xf32>
    %cst_8 = arith.constant 0.353553385 : f32
    %15 = vector.broadcast %cst_8 : f32 to vector<8x8xf32>
    %16 = arith.mulf %14, %15 : vector<8x8xf32>
    %cst_9 = arith.constant -1.000000e+30 : f32
    %17 = vector.broadcast %cst_9 : f32 to vector<8x8xf32>
    %18 = arith.select %3, %16, %17 : vector<8x8xi1>, vector<8x8xf32>
    %cst_10 = arith.constant dense<0xFF800000> : vector<8xf32>
    %19 = vector.multi_reduction <maximumf>, %18, %cst_10 [1] : vector<8x8xf32> to vector<8xf32>
    %20 = vector.shape_cast %19 : vector<8xf32> to vector<8x1xf32>
    %21 = vector.broadcast %20 : vector<8x1xf32> to vector<8x8xf32>
    %22 = arith.subf %18, %21 : vector<8x8xf32>
    %23 = math.exp %22 : vector<8x8xf32>
    %cst_11 = arith.constant dense<0.000000e+00> : vector<8xf32>
    %24 = vector.multi_reduction <add>, %23, %cst_11 [1] : vector<8x8xf32> to vector<8xf32>
    %25 = vector.shape_cast %24 : vector<8xf32> to vector<8x1xf32>
    %26 = tpu.reciprocal %25 : vector<8x1xf32> -> vector<8x1xf32>
    %27 = vector.broadcast %26 : vector<8x1xf32> to vector<8x8xf32>
    %28 = arith.mulf %23, %27 : vector<8x8xf32>
    %cst_12 = arith.constant dense<0.000000e+00> : vector<8x8xf32>
    %29 = tpu.matmul %28, %13, %cst_12 {dimension_numbers = #tpu.dot_dimension_numbers<[1], [0], [0], [1], [0, 0, 1, 1], [], []>} : vector<8x8xf32>, vector<8x8xf32>, vector<8x8xf32> -> vector<8x8xf32>
    %30 = vector.extract_strided_slice %10 {offsets = [0, 8], sizes = [8, 8], strides = [1, 1]} : vector<8x128xf32> to vector<8x8xf32>
    %31 = vector.extract_strided_slice %10 {offsets = [0, 40], sizes = [8, 8], strides = [1, 1]} : vector<8x128xf32> to vector<8x8xf32>
    %32 = vector.extract_strided_slice %10 {offsets = [0, 72], sizes = [8, 8], strides = [1, 1]} : vector<8x128xf32> to vector<8x8xf32>
    %cst_13 = arith.constant dense<0.000000e+00> : vector<8x8xf32>
    %33 = tpu.matmul %30, %31, %cst_13 {dimension_numbers = #tpu.dot_dimension_numbers<[1], [1], [0], [0], [0, 0, 1, 0], [], []>} : vector<8x8xf32>, vector<8x8xf32>, vector<8x8xf32> -> vector<8x8xf32>
    %cst_14 = arith.constant 0.353553385 : f32
    %34 = vector.broadcast %cst_14 : f32 to vector<8x8xf32>
    %35 = arith.mulf %33, %34 : vector<8x8xf32>
    %cst_15 = arith.constant -1.000000e+30 : f32
    %36 = vector.broadcast %cst_15 : f32 to vector<8x8xf32>
    %37 = arith.select %3, %35, %36 : vector<8x8xi1>, vector<8x8xf32>
    %cst_16 = arith.constant dense<0xFF800000> : vector<8xf32>
    %38 = vector.multi_reduction <maximumf>, %37, %cst_16 [1] : vector<8x8xf32> to vector<8xf32>
    %39 = vector.shape_cast %38 : vector<8xf32> to vector<8x1xf32>
    %40 = vector.broadcast %39 : vector<8x1xf32> to vector<8x8xf32>
    %41 = arith.subf %37, %40 : vector<8x8xf32>
    %42 = math.exp %41 : vector<8x8xf32>
    %cst_17 = arith.constant dense<0.000000e+00> : vector<8xf32>
    %43 = vector.multi_reduction <add>, %42, %cst_17 [1] : vector<8x8xf32> to vector<8xf32>
    %44 = vector.shape_cast %43 : vector<8xf32> to vector<8x1xf32>
    %45 = tpu.reciprocal %44 : vector<8x1xf32> -> vector<8x1xf32>
    %46 = vector.broadcast %45 : vector<8x1xf32> to vector<8x8xf32>
    %47 = arith.mulf %42, %46 : vector<8x8xf32>
    %cst_18 = arith.constant dense<0.000000e+00> : vector<8x8xf32>
    %48 = tpu.matmul %47, %32, %cst_18 {dimension_numbers = #tpu.dot_dimension_numbers<[1], [0], [0], [1], [0, 0, 1, 1], [], []>} : vector<8x8xf32>, vector<8x8xf32>, vector<8x8xf32> -> vector<8x8xf32>
    %49 = vector.extract_strided_slice %10 {offsets = [0, 16], sizes = [8, 8], strides = [1, 1]} : vector<8x128xf32> to vector<8x8xf32>
    %50 = vector.extract_strided_slice %10 {offsets = [0, 48], sizes = [8, 8], strides = [1, 1]} : vector<8x128xf32> to vector<8x8xf32>
    %51 = vector.extract_strided_slice %10 {offsets = [0, 80], sizes = [8, 8], strides = [1, 1]} : vector<8x128xf32> to vector<8x8xf32>
    %cst_19 = arith.constant dense<0.000000e+00> : vector<8x8xf32>
    %52 = tpu.matmul %49, %50, %cst_19 {dimension_numbers = #tpu.dot_dimension_numbers<[1], [1], [0], [0], [0, 0, 1, 0], [], []>} : vector<8x8xf32>, vector<8x8xf32>, vector<8x8xf32> -> vector<8x8xf32>
    %cst_20 = arith.constant 0.353553385 : f32
    %53 = vector.broadcast %cst_20 : f32 to vector<8x8xf32>
    %54 = arith.mulf %52, %53 : vector<8x8xf32>
    %cst_21 = arith.constant -1.000000e+30 : f32
    %55 = vector.broadcast %cst_21 : f32 to vector<8x8xf32>
    %56 = arith.select %3, %54, %55 : vector<8x8xi1>, vector<8x8xf32>
    %cst_22 = arith.constant dense<0xFF800000> : vector<8xf32>
    %57 = vector.multi_reduction <maximumf>, %56, %cst_22 [1] : vector<8x8xf32> to vector<8xf32>
    %58 = vector.shape_cast %57 : vector<8xf32> to vector<8x1xf32>
    %59 = vector.broadcast %58 : vector<8x1xf32> to vector<8x8xf32>
    %60 = arith.subf %56, %59 : vector<8x8xf32>
    %61 = math.exp %60 : vector<8x8xf32>
    %cst_23 = arith.constant dense<0.000000e+00> : vector<8xf32>
    %62 = vector.multi_reduction <add>, %61, %cst_23 [1] : vector<8x8xf32> to vector<8xf32>
    %63 = vector.shape_cast %62 : vector<8xf32> to vector<8x1xf32>
    %64 = tpu.reciprocal %63 : vector<8x1xf32> -> vector<8x1xf32>
    %65 = vector.broadcast %64 : vector<8x1xf32> to vector<8x8xf32>
    %66 = arith.mulf %61, %65 : vector<8x8xf32>
    %cst_24 = arith.constant dense<0.000000e+00> : vector<8x8xf32>
    %67 = tpu.matmul %66, %51, %cst_24 {dimension_numbers = #tpu.dot_dimension_numbers<[1], [0], [0], [1], [0, 0, 1, 1], [], []>} : vector<8x8xf32>, vector<8x8xf32>, vector<8x8xf32> -> vector<8x8xf32>
    %68 = vector.extract_strided_slice %10 {offsets = [0, 24], sizes = [8, 8], strides = [1, 1]} : vector<8x128xf32> to vector<8x8xf32>
    %69 = vector.extract_strided_slice %10 {offsets = [0, 56], sizes = [8, 8], strides = [1, 1]} : vector<8x128xf32> to vector<8x8xf32>
    %70 = vector.extract_strided_slice %10 {offsets = [0, 88], sizes = [8, 8], strides = [1, 1]} : vector<8x128xf32> to vector<8x8xf32>
    %cst_25 = arith.constant dense<0.000000e+00> : vector<8x8xf32>
    %71 = tpu.matmul %68, %69, %cst_25 {dimension_numbers = #tpu.dot_dimension_numbers<[1], [1], [0], [0], [0, 0, 1, 0], [], []>} : vector<8x8xf32>, vector<8x8xf32>, vector<8x8xf32> -> vector<8x8xf32>
    %cst_26 = arith.constant 0.353553385 : f32
    %72 = vector.broadcast %cst_26 : f32 to vector<8x8xf32>
    %73 = arith.mulf %71, %72 : vector<8x8xf32>
    %cst_27 = arith.constant -1.000000e+30 : f32
    %74 = vector.broadcast %cst_27 : f32 to vector<8x8xf32>
    %75 = arith.select %3, %73, %74 : vector<8x8xi1>, vector<8x8xf32>
    %cst_28 = arith.constant dense<0xFF800000> : vector<8xf32>
    %76 = vector.multi_reduction <maximumf>, %75, %cst_28 [1] : vector<8x8xf32> to vector<8xf32>
    %77 = vector.shape_cast %76 : vector<8xf32> to vector<8x1xf32>
    %78 = vector.broadcast %77 : vector<8x1xf32> to vector<8x8xf32>
    %79 = arith.subf %75, %78 : vector<8x8xf32>
    %80 = math.exp %79 : vector<8x8xf32>
    %cst_29 = arith.constant dense<0.000000e+00> : vector<8xf32>
    %81 = vector.multi_reduction <add>, %80, %cst_29 [1] : vector<8x8xf32> to vector<8xf32>
    %82 = vector.shape_cast %81 : vector<8xf32> to vector<8x1xf32>
    %83 = tpu.reciprocal %82 : vector<8x1xf32> -> vector<8x1xf32>
    %84 = vector.broadcast %83 : vector<8x1xf32> to vector<8x8xf32>
    %85 = arith.mulf %80, %84 : vector<8x8xf32>
    %cst_30 = arith.constant dense<0.000000e+00> : vector<8x8xf32>
    %86 = tpu.matmul %85, %70, %cst_30 {dimension_numbers = #tpu.dot_dimension_numbers<[1], [0], [0], [1], [0, 0, 1, 1], [], []>} : vector<8x8xf32>, vector<8x8xf32>, vector<8x8xf32> -> vector<8x8xf32>
    %87 = tpu.concatenate %29, %48, %67, %86 in 1 : vector<8x8xf32>, vector<8x8xf32>, vector<8x8xf32>, vector<8x8xf32> -> vector<8x32xf32>
    %c0_31 = arith.constant 0 : index
    %c0_32 = arith.constant 0 : index
    %c0_33 = arith.constant 0 : index
    %88 = vector.load %arg4[%c0_31, %c0_32, %c0_33] : memref<2x32x32xf32, #tpu.memory_space<vmem>>, vector<1x32x32xf32>
    %89 = vector.shape_cast %88 : vector<1x32x32xf32> to vector<32x32xf32>
    %cst_34 = arith.constant dense<0.000000e+00> : vector<8x32xf32>
    %90 = tpu.matmul %87, %89, %cst_34 {dimension_numbers = #tpu.dot_dimension_numbers<[1], [0], [0], [1], [0, 0, 1, 1], [], []>} : vector<8x32xf32>, vector<32x32xf32>, vector<8x32xf32> -> vector<8x32xf32>
    %c0_35 = arith.constant 0 : index
    %c0_36 = arith.constant 0 : index
    %c0_37 = arith.constant 0 : index
    %91 = vector.load %arg5[%c0_35, %c0_36, %c0_37] : memref<2x1x32xf32, #tpu.memory_space<vmem>>, vector<1x1x32xf32>
    %92 = vector.shape_cast %91 : vector<1x1x32xf32> to vector<1x32xf32>
    %93 = vector.broadcast %92 : vector<1x32xf32> to vector<8x32xf32>
    %94 = arith.addf %90, %93 : vector<8x32xf32>
    %95 = arith.addf %0, %94 : vector<8x32xf32>
    %c0_38 = arith.constant 0 : index
    %c0_39 = arith.constant 0 : index
    %c0_40 = arith.constant 0 : index
    %96 = vector.load %arg6[%c0_38, %c0_39, %c0_40] : memref<2x1x32xf32, #tpu.memory_space<vmem>>, vector<1x1x32xf32>
    %97 = vector.shape_cast %96 : vector<1x1x32xf32> to vector<1x32xf32>
    %c0_41 = arith.constant 0 : index
    %c0_42 = arith.constant 0 : index
    %c0_43 = arith.constant 0 : index
    %98 = vector.load %arg7[%c0_41, %c0_42, %c0_43] : memref<2x1x32xf32, #tpu.memory_space<vmem>>, vector<1x1x32xf32>
    %99 = vector.shape_cast %98 : vector<1x1x32xf32> to vector<1x32xf32>
    %cst_44 = arith.constant dense<0.000000e+00> : vector<8xf32>
    %100 = vector.multi_reduction <add>, %95, %cst_44 [1] : vector<8x32xf32> to vector<8xf32>
    %101 = vector.shape_cast %100 : vector<8xf32> to vector<8x1xf32>
    %cst_45 = arith.constant 3.200000e+01 : f32
    %102 = vector.broadcast %cst_45 : f32 to vector<8x1xf32>
    %103 = arith.divf %101, %102 : vector<8x1xf32>
    %104 = arith.mulf %95, %95 : vector<8x32xf32>
    %cst_46 = arith.constant dense<0.000000e+00> : vector<8xf32>
    %105 = vector.multi_reduction <add>, %104, %cst_46 [1] : vector<8x32xf32> to vector<8xf32>
    %106 = vector.shape_cast %105 : vector<8xf32> to vector<8x1xf32>
    %cst_47 = arith.constant 3.200000e+01 : f32
    %107 = vector.broadcast %cst_47 : f32 to vector<8x1xf32>
    %108 = arith.divf %106, %107 : vector<8x1xf32>
    %109 = arith.mulf %103, %103 : vector<8x1xf32>
    %110 = arith.subf %108, %109 : vector<8x1xf32>
    %111 = vector.broadcast %103 : vector<8x1xf32> to vector<8x32xf32>
    %112 = arith.subf %95, %111 : vector<8x32xf32>
    %cst_48 = arith.constant 9.99999974E-6 : f32
    %113 = vector.broadcast %cst_48 : f32 to vector<8x1xf32>
    %114 = arith.addf %110, %113 : vector<8x1xf32>
    %115 = math.rsqrt %114 : vector<8x1xf32>
    %116 = vector.broadcast %115 : vector<8x1xf32> to vector<8x32xf32>
    %117 = arith.mulf %112, %116 : vector<8x32xf32>
    %118 = vector.broadcast %97 : vector<1x32xf32> to vector<8x32xf32>
    %119 = arith.mulf %117, %118 : vector<8x32xf32>
    %120 = vector.broadcast %99 : vector<1x32xf32> to vector<8x32xf32>
    %121 = arith.addf %119, %120 : vector<8x32xf32>
    %c0_49 = arith.constant 0 : index
    %c0_50 = arith.constant 0 : index
    %c0_51 = arith.constant 0 : index
    %122 = vector.load %arg8[%c0_49, %c0_50, %c0_51] : memref<2x32x64xf32, #tpu.memory_space<vmem>>, vector<1x32x64xf32>
    %123 = vector.shape_cast %122 : vector<1x32x64xf32> to vector<32x64xf32>
    %cst_52 = arith.constant dense<0.000000e+00> : vector<8x64xf32>
    %124 = tpu.matmul %121, %123, %cst_52 {dimension_numbers = #tpu.dot_dimension_numbers<[1], [0], [0], [1], [0, 0, 1, 1], [], []>} : vector<8x32xf32>, vector<32x64xf32>, vector<8x64xf32> -> vector<8x64xf32>
    %c0_53 = arith.constant 0 : index
    %c0_54 = arith.constant 0 : index
    %c0_55 = arith.constant 0 : index
    %125 = vector.load %arg9[%c0_53, %c0_54, %c0_55] : memref<2x1x64xf32, #tpu.memory_space<vmem>>, vector<1x1x64xf32>
    %126 = vector.shape_cast %125 : vector<1x1x64xf32> to vector<1x64xf32>
    %127 = vector.broadcast %126 : vector<1x64xf32> to vector<8x64xf32>
    %128 = arith.addf %124, %127 : vector<8x64xf32>
    %cst_56 = arith.constant 0.000000e+00 : f32
    %129 = vector.broadcast %cst_56 : f32 to vector<8x64xf32>
    %130 = arith.maximumf %128, %129 : vector<8x64xf32>
    %c0_57 = arith.constant 0 : index
    %c0_58 = arith.constant 0 : index
    %c0_59 = arith.constant 0 : index
    %131 = vector.load %arg10[%c0_57, %c0_58, %c0_59] : memref<2x64x32xf32, #tpu.memory_space<vmem>>, vector<1x64x32xf32>
    %132 = vector.shape_cast %131 : vector<1x64x32xf32> to vector<64x32xf32>
    %cst_60 = arith.constant dense<0.000000e+00> : vector<8x32xf32>
    %133 = tpu.matmul %130, %132, %cst_60 {dimension_numbers = #tpu.dot_dimension_numbers<[1], [0], [0], [1], [0, 0, 1, 1], [], []>} : vector<8x64xf32>, vector<64x32xf32>, vector<8x32xf32> -> vector<8x32xf32>
    %c0_61 = arith.constant 0 : index
    %c0_62 = arith.constant 0 : index
    %c0_63 = arith.constant 0 : index
    %134 = vector.load %arg11[%c0_61, %c0_62, %c0_63] : memref<2x1x32xf32, #tpu.memory_space<vmem>>, vector<1x1x32xf32>
    %135 = vector.shape_cast %134 : vector<1x1x32xf32> to vector<1x32xf32>
    %136 = vector.broadcast %135 : vector<1x32xf32> to vector<8x32xf32>
    %137 = arith.addf %133, %136 : vector<8x32xf32>
    %138 = arith.addf %121, %137 : vector<8x32xf32>
    %c0_64 = arith.constant 0 : index
    %c0_65 = arith.constant 0 : index
    %c0_66 = arith.constant 0 : index
    %139 = vector.load %arg12[%c0_64, %c0_65, %c0_66] : memref<2x1x32xf32, #tpu.memory_space<vmem>>, vector<1x1x32xf32>
    %140 = vector.shape_cast %139 : vector<1x1x32xf32> to vector<1x32xf32>
    %c0_67 = arith.constant 0 : index
    %c0_68 = arith.constant 0 : index
    %c0_69 = arith.constant 0 : index
    %141 = vector.load %arg13[%c0_67, %c0_68, %c0_69] : memref<2x1x32xf32, #tpu.memory_space<vmem>>, vector<1x1x32xf32>
    %142 = vector.shape_cast %141 : vector<1x1x32xf32> to vector<1x32xf32>
    %cst_70 = arith.constant dense<0.000000e+00> : vector<8xf32>
    %143 = vector.multi_reduction <add>, %138, %cst_70 [1] : vector<8x32xf32> to vector<8xf32>
    %144 = vector.shape_cast %143 : vector<8xf32> to vector<8x1xf32>
    %cst_71 = arith.constant 3.200000e+01 : f32
    %145 = vector.broadcast %cst_71 : f32 to vector<8x1xf32>
    %146 = arith.divf %144, %145 : vector<8x1xf32>
    %147 = arith.mulf %138, %138 : vector<8x32xf32>
    %cst_72 = arith.constant dense<0.000000e+00> : vector<8xf32>
    %148 = vector.multi_reduction <add>, %147, %cst_72 [1] : vector<8x32xf32> to vector<8xf32>
    %149 = vector.shape_cast %148 : vector<8xf32> to vector<8x1xf32>
    %cst_73 = arith.constant 3.200000e+01 : f32
    %150 = vector.broadcast %cst_73 : f32 to vector<8x1xf32>
    %151 = arith.divf %149, %150 : vector<8x1xf32>
    %152 = arith.mulf %146, %146 : vector<8x1xf32>
    %153 = arith.subf %151, %152 : vector<8x1xf32>
    %154 = vector.broadcast %146 : vector<8x1xf32> to vector<8x32xf32>
    %155 = arith.subf %138, %154 : vector<8x32xf32>
    %cst_74 = arith.constant 9.99999974E-6 : f32
    %156 = vector.broadcast %cst_74 : f32 to vector<8x1xf32>
    %157 = arith.addf %153, %156 : vector<8x1xf32>
    %158 = math.rsqrt %157 : vector<8x1xf32>
    %159 = vector.broadcast %158 : vector<8x1xf32> to vector<8x32xf32>
    %160 = arith.mulf %155, %159 : vector<8x32xf32>
    %161 = vector.broadcast %140 : vector<1x32xf32> to vector<8x32xf32>
    %162 = arith.mulf %160, %161 : vector<8x32xf32>
    %163 = vector.broadcast %142 : vector<1x32xf32> to vector<8x32xf32>
    %164 = arith.addf %162, %163 : vector<8x32xf32>
    %c1 = arith.constant 1 : index
    %c0_75 = arith.constant 0 : index
    %c0_76 = arith.constant 0 : index
    %165 = vector.load %arg2[%c1, %c0_75, %c0_76] : memref<2x32x128xf32, #tpu.memory_space<vmem>>, vector<1x32x128xf32>
    %166 = vector.shape_cast %165 : vector<1x32x128xf32> to vector<32x128xf32>
    %cst_77 = arith.constant dense<0.000000e+00> : vector<8x128xf32>
    %167 = tpu.matmul %164, %166, %cst_77 {dimension_numbers = #tpu.dot_dimension_numbers<[1], [0], [0], [1], [0, 0, 1, 1], [], []>} : vector<8x32xf32>, vector<32x128xf32>, vector<8x128xf32> -> vector<8x128xf32>
    %c1_78 = arith.constant 1 : index
    %c0_79 = arith.constant 0 : index
    %c0_80 = arith.constant 0 : index
    %168 = vector.load %arg3[%c1_78, %c0_79, %c0_80] : memref<2x1x128xf32, #tpu.memory_space<vmem>>, vector<1x1x128xf32>
    %169 = vector.shape_cast %168 : vector<1x1x128xf32> to vector<1x128xf32>
    %170 = vector.broadcast %169 : vector<1x128xf32> to vector<8x128xf32>
    %171 = arith.addf %167, %170 : vector<8x128xf32>
    %172 = vector.extract_strided_slice %171 {offsets = [0, 0], sizes = [8, 8], strides = [1, 1]} : vector<8x128xf32> to vector<8x8xf32>
    %173 = vector.extract_strided_slice %171 {offsets = [0, 32], sizes = [8, 8], strides = [1, 1]} : vector<8x128xf32> to vector<8x8xf32>
    %174 = vector.extract_strided_slice %171 {offsets = [0, 64], sizes = [8, 8], strides = [1, 1]} : vector<8x128xf32> to vector<8x8xf32>
    %cst_81 = arith.constant dense<0.000000e+00> : vector<8x8xf32>
    %175 = tpu.matmul %172, %173, %cst_81 {dimension_numbers = #tpu.dot_dimension_numbers<[1], [1], [0], [0], [0, 0, 1, 0], [], []>} : vector<8x8xf32>, vector<8x8xf32>, vector<8x8xf32> -> vector<8x8xf32>
    %cst_82 = arith.constant 0.353553385 : f32
    %176 = vector.broadcast %cst_82 : f32 to vector<8x8xf32>
    %177 = arith.mulf %175, %176 : vector<8x8xf32>
    %cst_83 = arith.constant -1.000000e+30 : f32
    %178 = vector.broadcast %cst_83 : f32 to vector<8x8xf32>
    %179 = arith.select %3, %177, %178 : vector<8x8xi1>, vector<8x8xf32>
    %cst_84 = arith.constant dense<0xFF800000> : vector<8xf32>
    %180 = vector.multi_reduction <maximumf>, %179, %cst_84 [1] : vector<8x8xf32> to vector<8xf32>
    %181 = vector.shape_cast %180 : vector<8xf32> to vector<8x1xf32>
    %182 = vector.broadcast %181 : vector<8x1xf32> to vector<8x8xf32>
    %183 = arith.subf %179, %182 : vector<8x8xf32>
    %184 = math.exp %183 : vector<8x8xf32>
    %cst_85 = arith.constant dense<0.000000e+00> : vector<8xf32>
    %185 = vector.multi_reduction <add>, %184, %cst_85 [1] : vector<8x8xf32> to vector<8xf32>
    %186 = vector.shape_cast %185 : vector<8xf32> to vector<8x1xf32>
    %187 = tpu.reciprocal %186 : vector<8x1xf32> -> vector<8x1xf32>
    %188 = vector.broadcast %187 : vector<8x1xf32> to vector<8x8xf32>
    %189 = arith.mulf %184, %188 : vector<8x8xf32>
    %cst_86 = arith.constant dense<0.000000e+00> : vector<8x8xf32>
    %190 = tpu.matmul %189, %174, %cst_86 {dimension_numbers = #tpu.dot_dimension_numbers<[1], [0], [0], [1], [0, 0, 1, 1], [], []>} : vector<8x8xf32>, vector<8x8xf32>, vector<8x8xf32> -> vector<8x8xf32>
    %191 = vector.extract_strided_slice %171 {offsets = [0, 8], sizes = [8, 8], strides = [1, 1]} : vector<8x128xf32> to vector<8x8xf32>
    %192 = vector.extract_strided_slice %171 {offsets = [0, 40], sizes = [8, 8], strides = [1, 1]} : vector<8x128xf32> to vector<8x8xf32>
    %193 = vector.extract_strided_slice %171 {offsets = [0, 72], sizes = [8, 8], strides = [1, 1]} : vector<8x128xf32> to vector<8x8xf32>
    %cst_87 = arith.constant dense<0.000000e+00> : vector<8x8xf32>
    %194 = tpu.matmul %191, %192, %cst_87 {dimension_numbers = #tpu.dot_dimension_numbers<[1], [1], [0], [0], [0, 0, 1, 0], [], []>} : vector<8x8xf32>, vector<8x8xf32>, vector<8x8xf32> -> vector<8x8xf32>
    %cst_88 = arith.constant 0.353553385 : f32
    %195 = vector.broadcast %cst_88 : f32 to vector<8x8xf32>
    %196 = arith.mulf %194, %195 : vector<8x8xf32>
    %cst_89 = arith.constant -1.000000e+30 : f32
    %197 = vector.broadcast %cst_89 : f32 to vector<8x8xf32>
    %198 = arith.select %3, %196, %197 : vector<8x8xi1>, vector<8x8xf32>
    %cst_90 = arith.constant dense<0xFF800000> : vector<8xf32>
    %199 = vector.multi_reduction <maximumf>, %198, %cst_90 [1] : vector<8x8xf32> to vector<8xf32>
    %200 = vector.shape_cast %199 : vector<8xf32> to vector<8x1xf32>
    %201 = vector.broadcast %200 : vector<8x1xf32> to vector<8x8xf32>
    %202 = arith.subf %198, %201 : vector<8x8xf32>
    %203 = math.exp %202 : vector<8x8xf32>
    %cst_91 = arith.constant dense<0.000000e+00> : vector<8xf32>
    %204 = vector.multi_reduction <add>, %203, %cst_91 [1] : vector<8x8xf32> to vector<8xf32>
    %205 = vector.shape_cast %204 : vector<8xf32> to vector<8x1xf32>
    %206 = tpu.reciprocal %205 : vector<8x1xf32> -> vector<8x1xf32>
    %207 = vector.broadcast %206 : vector<8x1xf32> to vector<8x8xf32>
    %208 = arith.mulf %203, %207 : vector<8x8xf32>
    %cst_92 = arith.constant dense<0.000000e+00> : vector<8x8xf32>
    %209 = tpu.matmul %208, %193, %cst_92 {dimension_numbers = #tpu.dot_dimension_numbers<[1], [0], [0], [1], [0, 0, 1, 1], [], []>} : vector<8x8xf32>, vector<8x8xf32>, vector<8x8xf32> -> vector<8x8xf32>
    %210 = vector.extract_strided_slice %171 {offsets = [0, 16], sizes = [8, 8], strides = [1, 1]} : vector<8x128xf32> to vector<8x8xf32>
    %211 = vector.extract_strided_slice %171 {offsets = [0, 48], sizes = [8, 8], strides = [1, 1]} : vector<8x128xf32> to vector<8x8xf32>
    %212 = vector.extract_strided_slice %171 {offsets = [0, 80], sizes = [8, 8], strides = [1, 1]} : vector<8x128xf32> to vector<8x8xf32>
    %cst_93 = arith.constant dense<0.000000e+00> : vector<8x8xf32>
    %213 = tpu.matmul %210, %211, %cst_93 {dimension_numbers = #tpu.dot_dimension_numbers<[1], [1], [0], [0], [0, 0, 1, 0], [], []>} : vector<8x8xf32>, vector<8x8xf32>, vector<8x8xf32> -> vector<8x8xf32>
    %cst_94 = arith.constant 0.353553385 : f32
    %214 = vector.broadcast %cst_94 : f32 to vector<8x8xf32>
    %215 = arith.mulf %213, %214 : vector<8x8xf32>
    %cst_95 = arith.constant -1.000000e+30 : f32
    %216 = vector.broadcast %cst_95 : f32 to vector<8x8xf32>
    %217 = arith.select %3, %215, %216 : vector<8x8xi1>, vector<8x8xf32>
    %cst_96 = arith.constant dense<0xFF800000> : vector<8xf32>
    %218 = vector.multi_reduction <maximumf>, %217, %cst_96 [1] : vector<8x8xf32> to vector<8xf32>
    %219 = vector.shape_cast %218 : vector<8xf32> to vector<8x1xf32>
    %220 = vector.broadcast %219 : vector<8x1xf32> to vector<8x8xf32>
    %221 = arith.subf %217, %220 : vector<8x8xf32>
    %222 = math.exp %221 : vector<8x8xf32>
    %cst_97 = arith.constant dense<0.000000e+00> : vector<8xf32>
    %223 = vector.multi_reduction <add>, %222, %cst_97 [1] : vector<8x8xf32> to vector<8xf32>
    %224 = vector.shape_cast %223 : vector<8xf32> to vector<8x1xf32>
    %225 = tpu.reciprocal %224 : vector<8x1xf32> -> vector<8x1xf32>
    %226 = vector.broadcast %225 : vector<8x1xf32> to vector<8x8xf32>
    %227 = arith.mulf %222, %226 : vector<8x8xf32>
    %cst_98 = arith.constant dense<0.000000e+00> : vector<8x8xf32>
    %228 = tpu.matmul %227, %212, %cst_98 {dimension_numbers = #tpu.dot_dimension_numbers<[1], [0], [0], [1], [0, 0, 1, 1], [], []>} : vector<8x8xf32>, vector<8x8xf32>, vector<8x8xf32> -> vector<8x8xf32>
    %229 = vector.extract_strided_slice %171 {offsets = [0, 24], sizes = [8, 8], strides = [1, 1]} : vector<8x128xf32> to vector<8x8xf32>
    %230 = vector.extract_strided_slice %171 {offsets = [0, 56], sizes = [8, 8], strides = [1, 1]} : vector<8x128xf32> to vector<8x8xf32>
    %231 = vector.extract_strided_slice %171 {offsets = [0, 88], sizes = [8, 8], strides = [1, 1]} : vector<8x128xf32> to vector<8x8xf32>
    %cst_99 = arith.constant dense<0.000000e+00> : vector<8x8xf32>
    %232 = tpu.matmul %229, %230, %cst_99 {dimension_numbers = #tpu.dot_dimension_numbers<[1], [1], [0], [0], [0, 0, 1, 0], [], []>} : vector<8x8xf32>, vector<8x8xf32>, vector<8x8xf32> -> vector<8x8xf32>
    %cst_100 = arith.constant 0.353553385 : f32
    %233 = vector.broadcast %cst_100 : f32 to vector<8x8xf32>
    %234 = arith.mulf %232, %233 : vector<8x8xf32>
    %cst_101 = arith.constant -1.000000e+30 : f32
    %235 = vector.broadcast %cst_101 : f32 to vector<8x8xf32>
    %236 = arith.select %3, %234, %235 : vector<8x8xi1>, vector<8x8xf32>
    %cst_102 = arith.constant dense<0xFF800000> : vector<8xf32>
    %237 = vector.multi_reduction <maximumf>, %236, %cst_102 [1] : vector<8x8xf32> to vector<8xf32>
    %238 = vector.shape_cast %237 : vector<8xf32> to vector<8x1xf32>
    %239 = vector.broadcast %238 : vector<8x1xf32> to vector<8x8xf32>
    %240 = arith.subf %236, %239 : vector<8x8xf32>
    %241 = math.exp %240 : vector<8x8xf32>
    %cst_103 = arith.constant dense<0.000000e+00> : vector<8xf32>
    %242 = vector.multi_reduction <add>, %241, %cst_103 [1] : vector<8x8xf32> to vector<8xf32>
    %243 = vector.shape_cast %242 : vector<8xf32> to vector<8x1xf32>
    %244 = tpu.reciprocal %243 : vector<8x1xf32> -> vector<8x1xf32>
    %245 = vector.broadcast %244 : vector<8x1xf32> to vector<8x8xf32>
    %246 = arith.mulf %241, %245 : vector<8x8xf32>
    %cst_104 = arith.constant dense<0.000000e+00> : vector<8x8xf32>
    %247 = tpu.matmul %246, %231, %cst_104 {dimension_numbers = #tpu.dot_dimension_numbers<[1], [0], [0], [1], [0, 0, 1, 1], [], []>} : vector<8x8xf32>, vector<8x8xf32>, vector<8x8xf32> -> vector<8x8xf32>
    %248 = tpu.concatenate %190, %209, %228, %247 in 1 : vector<8x8xf32>, vector<8x8xf32>, vector<8x8xf32>, vector<8x8xf32> -> vector<8x32xf32>
    %c1_105 = arith.constant 1 : index
    %c0_106 = arith.constant 0 : index
    %c0_107 = arith.constant 0 : index
    %249 = vector.load %arg4[%c1_105, %c0_106, %c0_107] : memref<2x32x32xf32, #tpu.memory_space<vmem>>, vector<1x32x32xf32>
    %250 = vector.shape_cast %249 : vector<1x32x32xf32> to vector<32x32xf32>
    %cst_108 = arith.constant dense<0.000000e+00> : vector<8x32xf32>
    %251 = tpu.matmul %248, %250, %cst_108 {dimension_numbers = #tpu.dot_dimension_numbers<[1], [0], [0], [1], [0, 0, 1, 1], [], []>} : vector<8x32xf32>, vector<32x32xf32>, vector<8x32xf32> -> vector<8x32xf32>
    %c1_109 = arith.constant 1 : index
    %c0_110 = arith.constant 0 : index
    %c0_111 = arith.constant 0 : index
    %252 = vector.load %arg5[%c1_109, %c0_110, %c0_111] : memref<2x1x32xf32, #tpu.memory_space<vmem>>, vector<1x1x32xf32>
    %253 = vector.shape_cast %252 : vector<1x1x32xf32> to vector<1x32xf32>
    %254 = vector.broadcast %253 : vector<1x32xf32> to vector<8x32xf32>
    %255 = arith.addf %251, %254 : vector<8x32xf32>
    %256 = arith.addf %164, %255 : vector<8x32xf32>
    %c1_112 = arith.constant 1 : index
    %c0_113 = arith.constant 0 : index
    %c0_114 = arith.constant 0 : index
    %257 = vector.load %arg6[%c1_112, %c0_113, %c0_114] : memref<2x1x32xf32, #tpu.memory_space<vmem>>, vector<1x1x32xf32>
    %258 = vector.shape_cast %257 : vector<1x1x32xf32> to vector<1x32xf32>
    %c1_115 = arith.constant 1 : index
    %c0_116 = arith.constant 0 : index
    %c0_117 = arith.constant 0 : index
    %259 = vector.load %arg7[%c1_115, %c0_116, %c0_117] : memref<2x1x32xf32, #tpu.memory_space<vmem>>, vector<1x1x32xf32>
    %260 = vector.shape_cast %259 : vector<1x1x32xf32> to vector<1x32xf32>
    %cst_118 = arith.constant dense<0.000000e+00> : vector<8xf32>
    %261 = vector.multi_reduction <add>, %256, %cst_118 [1] : vector<8x32xf32> to vector<8xf32>
    %262 = vector.shape_cast %261 : vector<8xf32> to vector<8x1xf32>
    %cst_119 = arith.constant 3.200000e+01 : f32
    %263 = vector.broadcast %cst_119 : f32 to vector<8x1xf32>
    %264 = arith.divf %262, %263 : vector<8x1xf32>
    %265 = arith.mulf %256, %256 : vector<8x32xf32>
    %cst_120 = arith.constant dense<0.000000e+00> : vector<8xf32>
    %266 = vector.multi_reduction <add>, %265, %cst_120 [1] : vector<8x32xf32> to vector<8xf32>
    %267 = vector.shape_cast %266 : vector<8xf32> to vector<8x1xf32>
    %cst_121 = arith.constant 3.200000e+01 : f32
    %268 = vector.broadcast %cst_121 : f32 to vector<8x1xf32>
    %269 = arith.divf %267, %268 : vector<8x1xf32>
    %270 = arith.mulf %264, %264 : vector<8x1xf32>
    %271 = arith.subf %269, %270 : vector<8x1xf32>
    %272 = vector.broadcast %264 : vector<8x1xf32> to vector<8x32xf32>
    %273 = arith.subf %256, %272 : vector<8x32xf32>
    %cst_122 = arith.constant 9.99999974E-6 : f32
    %274 = vector.broadcast %cst_122 : f32 to vector<8x1xf32>
    %275 = arith.addf %271, %274 : vector<8x1xf32>
    %276 = math.rsqrt %275 : vector<8x1xf32>
    %277 = vector.broadcast %276 : vector<8x1xf32> to vector<8x32xf32>
    %278 = arith.mulf %273, %277 : vector<8x32xf32>
    %279 = vector.broadcast %258 : vector<1x32xf32> to vector<8x32xf32>
    %280 = arith.mulf %278, %279 : vector<8x32xf32>
    %281 = vector.broadcast %260 : vector<1x32xf32> to vector<8x32xf32>
    %282 = arith.addf %280, %281 : vector<8x32xf32>
    %c1_123 = arith.constant 1 : index
    %c0_124 = arith.constant 0 : index
    %c0_125 = arith.constant 0 : index
    %283 = vector.load %arg8[%c1_123, %c0_124, %c0_125] : memref<2x32x64xf32, #tpu.memory_space<vmem>>, vector<1x32x64xf32>
    %284 = vector.shape_cast %283 : vector<1x32x64xf32> to vector<32x64xf32>
    %cst_126 = arith.constant dense<0.000000e+00> : vector<8x64xf32>
    %285 = tpu.matmul %282, %284, %cst_126 {dimension_numbers = #tpu.dot_dimension_numbers<[1], [0], [0], [1], [0, 0, 1, 1], [], []>} : vector<8x32xf32>, vector<32x64xf32>, vector<8x64xf32> -> vector<8x64xf32>
    %c1_127 = arith.constant 1 : index
    %c0_128 = arith.constant 0 : index
    %c0_129 = arith.constant 0 : index
    %286 = vector.load %arg9[%c1_127, %c0_128, %c0_129] : memref<2x1x64xf32, #tpu.memory_space<vmem>>, vector<1x1x64xf32>
    %287 = vector.shape_cast %286 : vector<1x1x64xf32> to vector<1x64xf32>
    %288 = vector.broadcast %287 : vector<1x64xf32> to vector<8x64xf32>
    %289 = arith.addf %285, %288 : vector<8x64xf32>
    %cst_130 = arith.constant 0.000000e+00 : f32
    %290 = vector.broadcast %cst_130 : f32 to vector<8x64xf32>
    %291 = arith.maximumf %289, %290 : vector<8x64xf32>
    %c1_131 = arith.constant 1 : index
    %c0_132 = arith.constant 0 : index
    %c0_133 = arith.constant 0 : index
    %292 = vector.load %arg10[%c1_131, %c0_132, %c0_133] : memref<2x64x32xf32, #tpu.memory_space<vmem>>, vector<1x64x32xf32>
    %293 = vector.shape_cast %292 : vector<1x64x32xf32> to vector<64x32xf32>
    %cst_134 = arith.constant dense<0.000000e+00> : vector<8x32xf32>
    %294 = tpu.matmul %291, %293, %cst_134 {dimension_numbers = #tpu.dot_dimension_numbers<[1], [0], [0], [1], [0, 0, 1, 1], [], []>} : vector<8x64xf32>, vector<64x32xf32>, vector<8x32xf32> -> vector<8x32xf32>
    %c1_135 = arith.constant 1 : index
    %c0_136 = arith.constant 0 : index
    %c0_137 = arith.constant 0 : index
    %295 = vector.load %arg11[%c1_135, %c0_136, %c0_137] : memref<2x1x32xf32, #tpu.memory_space<vmem>>, vector<1x1x32xf32>
    %296 = vector.shape_cast %295 : vector<1x1x32xf32> to vector<1x32xf32>
    %297 = vector.broadcast %296 : vector<1x32xf32> to vector<8x32xf32>
    %298 = arith.addf %294, %297 : vector<8x32xf32>
    %299 = arith.addf %282, %298 : vector<8x32xf32>
    %c1_138 = arith.constant 1 : index
    %c0_139 = arith.constant 0 : index
    %c0_140 = arith.constant 0 : index
    %300 = vector.load %arg12[%c1_138, %c0_139, %c0_140] : memref<2x1x32xf32, #tpu.memory_space<vmem>>, vector<1x1x32xf32>
    %301 = vector.shape_cast %300 : vector<1x1x32xf32> to vector<1x32xf32>
    %c1_141 = arith.constant 1 : index
    %c0_142 = arith.constant 0 : index
    %c0_143 = arith.constant 0 : index
    %302 = vector.load %arg13[%c1_141, %c0_142, %c0_143] : memref<2x1x32xf32, #tpu.memory_space<vmem>>, vector<1x1x32xf32>
    %303 = vector.shape_cast %302 : vector<1x1x32xf32> to vector<1x32xf32>
    %cst_144 = arith.constant dense<0.000000e+00> : vector<8xf32>
    %304 = vector.multi_reduction <add>, %299, %cst_144 [1] : vector<8x32xf32> to vector<8xf32>
    %305 = vector.shape_cast %304 : vector<8xf32> to vector<8x1xf32>
    %cst_145 = arith.constant 3.200000e+01 : f32
    %306 = vector.broadcast %cst_145 : f32 to vector<8x1xf32>
    %307 = arith.divf %305, %306 : vector<8x1xf32>
    %308 = arith.mulf %299, %299 : vector<8x32xf32>
    %cst_146 = arith.constant dense<0.000000e+00> : vector<8xf32>
    %309 = vector.multi_reduction <add>, %308, %cst_146 [1] : vector<8x32xf32> to vector<8xf32>
    %310 = vector.shape_cast %309 : vector<8xf32> to vector<8x1xf32>
    %cst_147 = arith.constant 3.200000e+01 : f32
    %311 = vector.broadcast %cst_147 : f32 to vector<8x1xf32>
    %312 = arith.divf %310, %311 : vector<8x1xf32>
    %313 = arith.mulf %307, %307 : vector<8x1xf32>
    %314 = arith.subf %312, %313 : vector<8x1xf32>
    %315 = vector.broadcast %307 : vector<8x1xf32> to vector<8x32xf32>
    %316 = arith.subf %299, %315 : vector<8x32xf32>
    %cst_148 = arith.constant 9.99999974E-6 : f32
    %317 = vector.broadcast %cst_148 : f32 to vector<8x1xf32>
    %318 = arith.addf %314, %317 : vector<8x1xf32>
    %319 = math.rsqrt %318 : vector<8x1xf32>
    %320 = vector.broadcast %319 : vector<8x1xf32> to vector<8x32xf32>
    %321 = arith.mulf %316, %320 : vector<8x32xf32>
    %322 = vector.broadcast %301 : vector<1x32xf32> to vector<8x32xf32>
    %323 = arith.mulf %321, %322 : vector<8x32xf32>
    %324 = vector.broadcast %303 : vector<1x32xf32> to vector<8x32xf32>
    %325 = arith.addf %323, %324 : vector<8x32xf32>
    %c0_149 = arith.constant 0 : index
    %c0_150 = arith.constant 0 : index
    %326 = vector.load %arg14[%c0_149, %c0_150] : memref<32x128xf32, #tpu.memory_space<vmem>>, vector<32x128xf32>
    %cst_151 = arith.constant dense<0.000000e+00> : vector<8x128xf32>
    %327 = tpu.matmul %325, %326, %cst_151 {dimension_numbers = #tpu.dot_dimension_numbers<[1], [0], [0], [1], [0, 0, 1, 1], [], []>} : vector<8x32xf32>, vector<32x128xf32>, vector<8x128xf32> -> vector<8x128xf32>
    %c0_152 = arith.constant 0 : index
    %c0_153 = arith.constant 0 : index
    %328 = vector.load %arg15[%c0_152, %c0_153] : memref<1x128xf32, #tpu.memory_space<vmem>>, vector<1x128xf32>
    %329 = vector.broadcast %328 : vector<1x128xf32> to vector<8x128xf32>
    %330 = arith.addf %327, %329 : vector<8x128xf32>
    %c0_154 = arith.constant 0 : index
    %c0_155 = arith.constant 0 : index
    %331 = vector.load %arg16[%c0_154, %c0_155] : memref<8x128xf32, #tpu.memory_space<vmem>>, vector<8x128xf32>
    tpu.vector_store %arg16[%c0_154, %c0_155], %330 {strides = array<i32>} : memref<8x128xf32, #tpu.memory_space<vmem>>, vector<8x128xf32>,
    return
  }
  func.func @transform_0(%arg0: i32) -> (i32, i32) {
    %c0_i32 = arith.constant 0 : i32
    %c0_i32_0 = arith.constant 0 : i32
    return %arg0, %c0_i32 : i32, i32
  }
  func.func @transform_1(%arg0: i32) -> (i32, i32, i32) {
    %c0_i32 = arith.constant 0 : i32
    %c0_i32_0 = arith.constant 0 : i32
    %c0_i32_1 = arith.constant 0 : i32
    %c0_i32_2 = arith.constant 0 : i32
    return %c0_i32, %c0_i32_0, %c0_i32_1 : i32, i32, i32
  }
  func.func @transform_2(%arg0: i32) -> (i32, i32, i32) {
    %c0_i32 = arith.constant 0 : i32
    %c0_i32_0 = arith.constant 0 : i32
    %c0_i32_1 = arith.constant 0 : i32
    %c0_i32_2 = arith.constant 0 : i32
    return %c0_i32, %c0_i32_0, %c0_i32_1 : i32, i32, i32
  }
  func.func @transform_3(%arg0: i32) -> (i32, i32, i32) {
    %c0_i32 = arith.constant 0 : i32
    %c0_i32_0 = arith.constant 0 : i32
    %c0_i32_1 = arith.constant 0 : i32
    %c0_i32_2 = arith.constant 0 : i32
    return %c0_i32, %c0_i32_0, %c0_i32_1 : i32, i32, i32
  }
  func.func @transform_4(%arg0: i32) -> (i32, i32, i32) {
    %c0_i32 = arith.constant 0 : i32
    %c0_i32_0 = arith.constant 0 : i32
    %c0_i32_1 = arith.constant 0 : i32
    %c0_i32_2 = arith.constant 0 : i32
    return %c0_i32, %c0_i32_0, %c0_i32_1 : i32, i32, i32
  }
  func.func @transform_5(%arg0: i32) -> (i32, i32, i32) {
    %c0_i32 = arith.constant 0 : i32
    %c0_i32_0 = arith.constant 0 : i32
    %c0_i32_1 = arith.constant 0 : i32
    %c0_i32_2 = arith.constant 0 : i32
    return %c0_i32, %c0_i32_0, %c0_i32_1 : i32, i32, i32
  }
  func.func @transform_6(%arg0: i32) -> (i32, i32, i32) {
    %c0_i32 = arith.constant 0 : i32
    %c0_i32_0 = arith.constant 0 : i32
    %c0_i32_1 = arith.constant 0 : i32
    %c0_i32_2 = arith.constant 0 : i32
    return %c0_i32, %c0_i32_0, %c0_i32_1 : i32, i32, i32
  }
  func.func @transform_7(%arg0: i32) -> (i32, i32, i32) {
    %c0_i32 = arith.constant 0 : i32
    %c0_i32_0 = arith.constant 0 : i32
    %c0_i32_1 = arith.constant 0 : i32
    %c0_i32_2 = arith.constant 0 : i32
    return %c0_i32, %c0_i32_0, %c0_i32_1 : i32, i32, i32
  }
  func.func @transform_8(%arg0: i32) -> (i32, i32, i32) {
    %c0_i32 = arith.constant 0 : i32
    %c0_i32_0 = arith.constant 0 : i32
    %c0_i32_1 = arith.constant 0 : i32
    %c0_i32_2 = arith.constant 0 : i32
    return %c0_i32, %c0_i32_0, %c0_i32_1 : i32, i32, i32
  }
  func.func @transform_9(%arg0: i32) -> (i32, i32, i32) {
    %c0_i32 = arith.constant 0 : i32
    %c0_i32_0 = arith.constant 0 : i32
    %c0_i32_1 = arith.constant 0 : i32
    %c0_i32_2 = arith.constant 0 : i32
    return %c0_i32, %c0_i32_0, %c0_i32_1 : i32, i32, i32
  }
  func.func @transform_10(%arg0: i32) -> (i32, i32, i32) {
    %c0_i32 = arith.constant 0 : i32
    %c0_i32_0 = arith.constant 0 : i32
    %c0_i32_1 = arith.constant 0 : i32
    %c0_i32_2 = arith.constant 0 : i32
    return %c0_i32, %c0_i32_0, %c0_i32_1 : i32, i32, i32
  }
  func.func @transform_11(%arg0: i32) -> (i32, i32, i32) {
    %c0_i32 = arith.constant 0 : i32
    %c0_i32_0 = arith.constant 0 : i32
    %c0_i32_1 = arith.constant 0 : i32
    %c0_i32_2 = arith.constant 0 : i32
    return %c0_i32, %c0_i32_0, %c0_i32_1 : i32, i32, i32
  }
  func.func @transform_12(%arg0: i32) -> (i32, i32, i32) {
    %c0_i32 = arith.constant 0 : i32
    %c0_i32_0 = arith.constant 0 : i32
    %c0_i32_1 = arith.constant 0 : i32
    %c0_i32_2 = arith.constant 0 : i32
    return %c0_i32, %c0_i32_0, %c0_i32_1 : i32, i32, i32
  }
  func.func @transform_13(%arg0: i32) -> (i32, i32) {
    %c0_i32 = arith.constant 0 : i32
    %c0_i32_0 = arith.constant 0 : i32
    %c0_i32_1 = arith.constant 0 : i32
    return %c0_i32, %c0_i32_0 : i32, i32
  }
  func.func @transform_14(%arg0: i32) -> (i32, i32) {
    %c0_i32 = arith.constant 0 : i32
    %c0_i32_0 = arith.constant 0 : i32
    %c0_i32_1 = arith.constant 0 : i32
    return %c0_i32, %c0_i32_0 : i32, i32
  }
  func.func @transform_15(%arg0: i32) -> (i32, i32) {
    %c0_i32 = arith.constant 0 : i32
    %c0_i32_0 = arith.constant 0 : i32
    return %arg0, %c0_i32 : i32, i32
  }
}

</mosaic_0001>

<bundles_post_ra>
// kernel: transformer_lm_forward.1
= control target key start
LH: loop header
LB: loop body
LE: loop exit
PB: predicated region body
PF: predicated region fallthrough
CT: control target
= control target key end

     0   :  { %s4059_s0 = inlined_call_operand.vmem [shape: f32[16,32], index: 0, kind: input, shape index: {}]   ;;  %s4060_s1 = inlined_call_operand.vmem [shape: f32[2,32,128], index: 1, kind: input, shape index: {}]   ;;  %s4061_s2 = inlined_call_operand.vmem [shape: f32[2,1,128], index: 2, kind: input, shape index: {}]   ;;  %s4062_s3 = inlined_call_operand.vmem [shape: f32[2,32,32], index: 3, kind: input, shape index: {}]   ;;  %s4063_s4 = inlined_call_operand.vmem [shape: f32[2,1,32], index: 4, kind: input, shape index: {}]   ;;  %s4064_s5 = inlined_call_operand.vmem [shape: f32[2,1,32], index: 5, kind: input, shape index: {}]   ;;  %s4065_s6 = inlined_call_operand.vmem [shape: f32[2,1,32], index: 6, kind: input, shape index: {}]   ;;  %s4066_s7 = inlined_call_operand.vmem [shape: f32[2,32,64], index: 7, kind: input, shape index: {}]   ;;  %s4067_s8 = inlined_call_operand.vmem [shape: f32[2,1,64], index: 8, kind: input, shape index: {}]   ;;  %s4068_s9 = inlined_call_operand.vmem [shape: f32[2,64,32], index: 9, kind: input, shape index: {}]   ;;  %s4069_s10 = inlined_call_operand.vmem [shape: f32[2,1,32], index: 10, kind: input, shape index: {}]   ;;  %s4070_s11 = inlined_call_operand.vmem [shape: f32[2,1,32], index: 11, kind: input, shape index: {}]   ;;  %s4071_s12 = inlined_call_operand.vmem [shape: f32[2,1,32], index: 12, kind: input, shape index: {}]   ;;  %s4072_s13 = inlined_call_operand.vmem [shape: f32[32,128], index: 13, kind: input, shape index: {}]   ;;  %s4073_s14 = inlined_call_operand.vmem [shape: f32[1,128], index: 14, kind: input, shape index: {}]   ;;  %s4074_s15 = inlined_call_operand.hbm [shape: f32[16,128], index: 15, kind: output, shape index: {}]  }
   0x1   :  { %4090 = sst [smem:[#allocation7_spill]] %s4059_s0 }
   0x2   :  { %4091 = sst [smem:[#allocation8_spill]] %s4060_s1 }
   0x3   :  { %4092 = sst [smem:[#allocation9_spill]] %s4061_s2 }
   0x4   :  { %20 = vsyncpa [#allocation3], 0 }
   0x5   :  { %22 = vsyncpa [#allocation3 + $0x1], 0  ;;  %s3538_s18 = smov 0   ;;  %s3540_s19 = smov 0  }
   0x6   :  { %s3542_s20 = smov 0   ;;  %s3544_s21 = smov 0  }
   0x7 LB: > { %4093 = sst [smem:[#allocation5_spill]] %s3434_s20  ;;  %s3559_s22 = sadd.s32 4294967295, %s3438_s21   ;;  %s3438_s21 = sphi %s3544_s21, %s4120_s21   ;;  %s3434_s20 = sphi %s3542_s20, %s4117_s20   ;;  %s3430_s19 = sphi %s3540_s19, %s4119_s19   ;;  %s3426_s18 = sphi %s3538_s18, %s4118_s18  }
   0x8   : > { %s2846_s23 = sadd.s32 4294967294, %s3438_s21   ;;  %s3563_s24 = sadd.s32 1, %s3438_s21  }
   0x9   : > { %s355_s25 = sadd.s32 1, %s3434_s20  ;;  %s352_s26 = ssub.s32 %s3438_s21, %s3563_s24 }
   0xa   : > { %p365_p0 = scmp.ne.s32.totalorder %s3434_s20, %s3430_s19  ;;  %p353_p1 = scmp.eq.s32.totalorder %s352_s26, 0 }
   0xb   : > { %p366_p2 = scmp.eq.s32.totalorder %s3559_s22, 1  ;;  %p371_p3 = scmp.ne.s32.totalorder %s3430_s19, %s3426_s18 }
   0xc   : > { %p372_p4 = scmp.eq.s32.totalorder %s2846_s23, 1  ;;  %p2849_p7 = scmp.ge.s32.totalorder %s3438_s21, 1 }
   0xd   : > { %s3574_s27 = scalar_select %p353_p1, %s3434_s20, %s355_s25  }
   0xe   : > { %p3576_p5 = por %p366_p2, %p365_p0  ;;  %p3580_p6 = por %p372_p4, %p371_p3 }
   0xf   : > { %4094 = sst [smem:[#allocation6_spill]] %s3574_s27  ;;  %p439_p8 = scmp.lt.s32.totalorder %s3438_s21, 3 }
  0x11   : > { %p440_p9 = pnand %p2849_p7, %p439_p8 }
  0x12   : > { %s4097_s1 = sld [smem:[#allocation8_spill]] (!%p440_p9)  ;;  %v3440_v3 = vmov (!%p440_p9), 0.0|0.0   ;;  %vm3441_vm0 = vmmov (!%p440_p9), 0   ;;  %v3442_v6 = vmov (!%p440_p9), 0.0   ;;  %p486_p10 = scmp.lt.s32.totalorder (!%p440_p9), %s3559_s22, 1  ;;  %vm507_vm1 = vcmask (!%p440_p9), 261120  }
  0x13   : > { %443 = sbr.rel (%p440_p9) target bundleno = 5250 (0x1482), region = 80  ;;  %3214 = vmatprep.subr.bf16.mxu0 (!%p440_p9), %v3440_v3  ;;  %3027 = vmatprep.mubr.msk.f32.mxu0 (!%p440_p9), %vm3441_vm0, %v3442_v6  ;;  %s4098_s0 = sld [smem:[#allocation7_spill]] (!%p440_p9)  ;;  %vm584_vm2 = vcmask (!%p440_p9), 64512   ;;  %v491_v18 = vlaneseq (!%p440_p9)  ;;  %vm1262_vm4 = vcmask (!%p440_p9), 130048   ;;  %vm1264_vm5 = vcmask (!%p440_p9), 195584  }
  0x14   : > { %3030 = vmatprep.subr.mxu1 (!%p440_p9), %v3442_v6  ;;  %3032 = vmatprep.mubr.msk.f32.mxu1 (!%p440_p9), %vm3441_vm0, %v3442_v6  ;;  %s4099_s2 = sld [smem:[#allocation9_spill]] (!%p440_p9)  ;;  %s4076_s26 = smov (!%p440_p9), 64   ;;  %vm1483_vm6 = vcmask (!%p440_p9), 523264  }
  0x15   : > { %s4083_s17 = smov (!%p440_p9), 120   ;;  %s4078_s20 = smov (!%p440_p9), 80   ;;  %v492_v19 = vshrl.u32 (!%p440_p9), %v491_v18, 7  ;;  %v494_v20 = vand.u32 (!%p440_p9), 127, %v491_v18 }
  0x16   : > { %s4084_s23 = smov (!%p440_p9), 112   ;;  %s4082_s25 = smov (!%p440_p9), 104  }
  0x17   : > { %vm3641_vm3 = vcmp.ge.s32.totalorder (!%p440_p9), %v492_v19, %v494_v20 }
  0x18   : > { %v496_v0 = vld [vmem:[%s4097_s1] sm:$0xff] (!%p440_p9)  ;;  %v497_v1 = vld [vmem:[%s4097_s1 + $0x8] sm:$0xff] (!%p440_p9)  ;;  %v498_v2 = vld [vmem:[%s4097_s1 + $0x10] sm:$0xff] (!%p440_p9) }
  0x19   : > { %v3215_v4 = vpack.c.bf16 (!%p440_p9), %v497_v1, %v496_v0  ;;  %v499_v5 = vld [vmem:[%s4097_s1 + $0x18] sm:$0xff] (!%p440_p9) }
  0x1a   : > { %v3218_v7 = vpack.c.bf16 %v499_v5, %v498_v2  ;;  %s487_s30 = scalar_select %p486_p10, %s3559_s22, 1  ;;  %v2852_v9 = vld [vmem:[%s4099_s2] ss:$0 sm:$0xff] }
  0x1b   : > { %3216 = vmatpush3.bf16.msra.mxu0 %v3215_v4 }
  0x1c   : > { %3217 = vmatprep.subr.bf16.mxu0 %v3440_v3  ;;  %s2851_s16 = sshll.u32 %s487_s30, 3  ;;  %s4085_s30 = smov 96  }
  0x1d   : > { %s489_s27 = scalar_lea.vmem %s4098_s0, %s2851_s16  ;;  %s4086_s16 = smov 88  }
  0x1e   : > { %v3610_v8 = vld [vmem:[%s489_s27] sm:$0xff]  ;;  %s4077_s27 = smov 72   ;;  %s4103_s0 = smov 96  }
  0x1f   : > { %3219 = vmatpush3.bf16.msra.mxu0 %v3218_v7 }
  0x20   : > { %3050 = vmatprep.subr.mxu0 %v3442_v6 }
  0x22   : > { %3028 = vmatmul.mubr.msk.f32.vlgmr.msra.gmra.mrb[0].mxu0 %vm507_vm1, %v3610_v8 }
  0x23   : > { %3052 = vmatprep.mubr.msk.f32.mxu0 %vm3441_vm0, %v3442_v6 }
  0xf5   : > { %v577_v10 = vpop.f32.mrb[0].mxu0 }
  0xf6   : > { %v3620_v11 = vadd.f32 %v2852_v9, %v577_v10  ;;  %v3029_v12 = vpop.f32.mrb[1].mxu0 }
  0xf8   : > { %672 = vrot.lane.b32.xlu1 %v3620_v11, %s4076_s26  ;;  %582 = vrot.lane.b32.xlu0 %v3620_v11, %s4085_s30  ;;  %s4081_s26 = smov 56   ;;  %s4105_s30 = smov 120  }
  0xfc   : > { %750 = vrot.lane.b32.xlu1 %v3620_v11, %s4086_s16  ;;  %s4106_s16 = smov 104  }
 0x100   : > { %748 = vrot.lane.b32.xlu1 %v3620_v11, %s4083_s17  ;;  %s4087_s17 = smov 24  }
 0x104   : > { %917 = vrot.lane.b32.xlu1 %v3620_v11, %s4078_s20  ;;  %s4079_s20 = smov 40  }
 0x16a   : > { %v673_v13 = vpop.permute.xlu1 %672  ;;  %v583_v14 = vpop.permute.xlu0 %582 }
 0x16b   : > { %3031 = vmatpush3.xpose.msk.msra.mxu1 %vm584_vm2, %v583_v14 }
 0x16c   : > { %3035 = vmatprep.subr.mxu1 %v3442_v6 }
 0x16e   : > { %v751_v15 = vpop.permute.xlu1 %750  ;;  %3033 = vmatmul.mubr.msk.f32.vlgmr.msra.gmra.mrb[0].mxu1 %vm584_vm2, %v3620_v11 }
 0x16f   : > { %3036 = vmatpush3.msra.mxu1 %v673_v13  ;;  %3037 = vmatprep.mubr.msk.f32.mxu1 %vm3441_vm0, %v3442_v6 }
 0x170   : > { %3040 = vmatprep.subr.mxu1 %v3442_v6 }
 0x172   : > { %v749_v16 = vpop.permute.xlu1 %748 }
 0x176   : > { %v918_v17 = vpop.permute.xlu1 %917 }
 0x177   : > { %3051 = vmatpush3.xpose.msk.msra.mxu0 %vm584_vm2, %v918_v17 }
 0x178   : > { %3060 = vmatprep.subr.mxu0 %v3442_v6 }
 0x241   : > { %v655_v21 = vpop.f32.mrb[0].mxu1 }
 0x242   : > { %v659_v23 = vmul.f32 0.35355338, %v655_v21  ;;  %v3034_v24 = vpop.f32.mrb[1].mxu1  ;;  %v1266_v21 = vld [vmem:[%s4062_s3] sm:$0xff] }
 0x244   : > { %v660_v25 = vsel %vm3641_vm3, %v659_v23, -1e+30  ;;  %v1267_v23 = vld [vmem:[%s4062_s3 + $0x8] sm:$0xff] }
 0x245   : > { %v661_v26 = vsel %vm584_vm2, %v660_v25, -inf  ;;  %v3221_v24 = vpack.c.bf16 %v1267_v23, %v1266_v21 }
 0x246   : > { %662 = vmax.xlane.f32.xlu0 %v661_v26  ;;  %v1269_v26 = vld [vmem:[%s4062_s3 + $0x18] sm:$0xff] }
 0x25c   : > { %1084 = vrot.lane.b32.xlu0 %v3620_v11, %s4077_s27  ;;  %s4080_s27 = smov 48  }
 0x2d3   : > { %v663_v27 = vpop.xlane.xlu0 %662 }
 0x2d4   : > { %v664_v28 = vsub.f32 %v660_v25, %v663_v27  ;;  %v1268_v25 = vld [vmem:[%s4062_s3 + $0x10] sm:$0xff] }
 0x2d5   : > { %v3224_v27 = vpack.c.bf16 %v1269_v26, %v1268_v25 }
 0x2d6   : > { %v665_v29 = vmul.f32 1.442695, %v664_v28 }
 0x2d7   : > { %v1085_v34 = vpop.permute.xlu0 %1084 }
 0x2d8   : > { %3336 = vpow2.f32 %v665_v29 }
 0x2e2   : > { %v3337_v30 = vpop.eup %3336 }
 0x2e3   : > { %v667_v31 = vsel %vm584_vm2, %v3337_v30, 0.0 }
 0x2e4   : > { %668 = vadd.xlane.f32.xlu1 %v667_v31 }
 0x2f5   : > { %915 = vrot.lane.b32.xlu1 %v3620_v11, %s4084_s23  ;;  %s4110_s23 = smov 64  }
 0x2f9   : > { %1082 = vrot.lane.b32.xlu1 %v3620_v11, %s4082_s25  ;;  %s4104_s25 = smov 112  }
 0x371   : > { %v669_v32 = vpop.xlane.xlu1 %668 }
 0x372   : > { %3338 = vrcp.f32 %v669_v32 }
 0x375   : > { %v916_v33 = vpop.permute.xlu1 %915 }
 0x376   : > { %3053 = vmatmul.mubr.msk.f32.vlgmr.msra.gmra.mrb[2].mxu0 %vm584_vm2, %v916_v33 }
 0x377   : > { %3061 = vmatpush3.xpose.msk.msra.mxu0 %vm584_vm2, %v1085_v34  ;;  %3062 = vmatprep.mubr.msk.f32.mxu0 %vm3441_vm0, %v3442_v6 }
 0x378   : > { %3220 = vmatprep.subr.bf16.mxu0 %v3440_v3 }
 0x379   : > { %v1083_v35 = vpop.permute.xlu1 %1082 }
 0x37a   : > { %3063 = vmatmul.mubr.msk.f32.vlgmr.msra.gmra.mrb[4].mxu0 %vm584_vm2, %v1083_v35 }
 0x37b   : > { %3078 = vmatprep.mubr.msk.f32.mxu0 %vm3441_vm0, %v3442_v6  ;;  %3222 = vmatpush3.bf16.msra.mxu0 %v3221_v24  ;;  %v2872_v24 = vld [vmem:[%s4069_s10] ss:$0 sm:$0xff] }
 0x37c   : > { %v3339_v36 = vpop.eup %3338  ;;  %3223 = vmatprep.subr.bf16.mxu0 %v3440_v3 }
 0x37d   : > { %v671_v37 = vmul.f32 %v3339_v36, %v3337_v30 }
 0x37f   : > { %3038 = vmatmul.mubr.msk.f32.vlgmr.msra.gmra.mrb[2].mxu1 %vm584_vm2, %v671_v37  ;;  %3225 = vmatpush3.bf16.msra.mxu0 %v3224_v27 }
 0x380   : > { %3041 = vmatpush3.xpose.msk.msra.mxu1 %vm584_vm2, %v751_v15  ;;  %3042 = vmatprep.mubr.msk.f32.mxu1 %vm3441_vm0, %v3442_v6 }
 0x381   : > { %3045 = vmatprep.subr.mxu1 %v3442_v6  ;;  %3232 = vmatprep.subr.bf16.mxu0 %v3440_v3 }
 0x383   : > { %3043 = vmatmul.mubr.msk.f32.vlgmr.msra.gmra.mrb[4].mxu1 %vm584_vm2, %v749_v16 }
 0x384   : > { %3047 = vmatprep.mubr.msk.f32.mxu1 %vm3441_vm0, %v3442_v6 }
 0x449   : > { %v989_v38 = vpop.f32.mrb[2].mxu0 }
 0x44a   : > { %v993_v39 = vmul.f32 0.35355338, %v989_v38  ;;  %v3054_v40 = vpop.f32.mrb[3].mxu0 }
 0x44b   : > { %v2866_v40 = vld [vmem:[%s4063_s4] ss:$0 sm:$0xff] }
 0x44c   : > { %v994_v41 = vsel %vm3641_vm3, %v993_v39, -1e+30 }
 0x44d   : > { %v1156_v42 = vpop.f32.mrb[4].mxu0  ;;  %v995_v43 = vsel %vm584_vm2, %v994_v41, -inf }
 0x44e   : > { %996 = vmax.xlane.f32.xlu0 %v995_v43  ;;  %v3064_v44 = vpop.f32.mrb[5].mxu0  ;;  %v1160_v48 = vmul.f32 0.35355338, %v1156_v42 }
 0x450   : > { %v1161_v53 = vsel %vm3641_vm3, %v1160_v48, -1e+30  ;;  %v1383_v48 = vld [vmem:[%s4066_s7] sm:$0xff] }
 0x451   : > { %v1162_v54 = vsel %vm584_vm2, %v1161_v53, -inf }
 0x452   : > { %v3674_v45 = vpop.f32.mrb[2].mxu1 }
 0x453   : > { %v3039_v46 = vpop.f32.mrb[3].mxu1 }
 0x456   : > { %v822_v47 = vpop.f32.mrb[4].mxu1 }
 0x457   : > { %v826_v49 = vmul.f32 0.35355338, %v822_v47  ;;  %v3044_v50 = vpop.f32.mrb[5].mxu1 }
 0x459   : > { %v827_v51 = vsel %vm3641_vm3, %v826_v49, -1e+30  ;;  %v1384_v49 = vld [vmem:[%s4066_s7 + $0x8] sm:$0xff] }
 0x45a   : > { %v828_v52 = vsel %vm584_vm2, %v827_v51, -inf  ;;  %v3227_v50 = vpack.c.bf16 %v1384_v49, %v1383_v48  ;;  %v2875_v49 = vld [vmem:[%s4071_s12] ss:$0 sm:$0xff] }
 0x45b   : > { %829 = vmax.xlane.f32.xlu1 %v828_v52 }
 0x45f   : > { %1163 = vmax.xlane.f32.xlu1 %v1162_v54  ;;  %v1469_v54 = vld [vmem:[%s4068_s9 + $0x8] sm:$0xff] }
 0x4db   : > { %v997_v55 = vpop.xlane.xlu0 %996 }
 0x4dc   : > { %v998_v56 = vsub.f32 %v994_v41, %v997_v55  ;;  %v1470_v55 = vld [vmem:[%s4068_s9 + $0x10] sm:$0xff] }
 0x4de   : > { %v999_v57 = vmul.f32 1.442695, %v998_v56 }
 0x4e0   : > { %3340 = vpow2.f32 %v999_v57  ;;  %v1471_v57 = vld [vmem:[%s4068_s9 + $0x18] sm:$0xff] }
 0x4e8   : > { %v830_v58 = vpop.xlane.xlu1 %829 }
 0x4e9   : > { %v831_v2 = vsub.f32 %v827_v51, %v830_v58  ;;  %v1386_v51 = vld [vmem:[%s4066_s7 + $0x18] sm:$0xff]  ;;  %v3236_v58 = vpack.c.bf16 %v1471_v57, %v1470_v55 }
 0x4ea   : > { %v3341_v59 = vpop.eup %3340 }
 0x4eb   : > { %v1001_v60 = vsel %vm584_vm2, %v3341_v59, 0.0  ;;  %v832_v4 = vmul.f32 1.442695, %v831_v2 }
 0x4ec   : > { %1002 = vadd.xlane.f32.xlu1 %v1001_v60  ;;  %v1164_v61 = vpop.xlane.xlu1 %1163  ;;  %v1473_v60 = vld [vmem:[%s4068_s9 + $0x28] sm:$0xff] }
 0x4ed   : > { %v1165_v62 = vsub.f32 %v1161_v53, %v1164_v61  ;;  %v1468_v53 = vld [vmem:[%s4068_s9] sm:$0xff] }
 0x4ee   : > { %v3233_v56 = vpack.c.bf16 %v1469_v54, %v1468_v53 }
 0x4ef   : > { %v1166_v63 = vmul.f32 1.442695, %v1165_v62 }
 0x4f1   : > { %3342 = vpow2.f32 %v1166_v63 }
 0x4f2   : > { %3344 = vpow2.f32 %v832_v4 }
 0x4fb   : > { %v3343_v0 = vpop.eup %3342 }
 0x4fc   : > { %v1168_v1 = vsel %vm584_vm2, %v3343_v0, 0.0  ;;  %v3345_v5 = vpop.eup %3344 }
 0x4fd   : > { %839 = vrot.lane.b32.xlu1 %v3620_v11, %s4081_s26  ;;  %1169 = vadd.xlane.f32.xlu0 %v1168_v1  ;;  %v834_v7 = vsel %vm584_vm2, %v3345_v5, 0.0  ;;  %s4088_s26 = smov 16  }
 0x513   : > { %1006 = vrot.lane.b32.xlu0 %v3620_v11, %s4080_s27  ;;  %s4109_s27 = smov 56  }
 0x521   : > { %835 = vadd.xlane.f32.xlu1 %v834_v7 }
 0x532   : > { %1173 = vrot.lane.b32.xlu1 %v3620_v11, %s4079_s20  ;;  %s4089_s20 = smov 8  }
 0x579   : > { %v1003_v9 = vpop.xlane.xlu1 %1002 }
 0x57d   : > { %v840_v10 = vpop.permute.xlu1 %839 }
 0x57e   : > { %3046 = vmatpush3.msra.mxu1 %v840_v10  ;;  %v2868_v10 = vld [vmem:[%s4064_s5] ss:$0 sm:$0xff] }
 0x57f   : > { %3055 = vmatprep.subr.mxu1 %v3442_v6 }
 0x58a   : > { %v1170_v13 = vpop.xlane.xlu0 %1169 }
 0x58e   : > { %v1007_v17 = vpop.permute.xlu0 %1006 }
 0x5ae   : > { %v836_v12 = vpop.xlane.xlu1 %835 }
 0x5af   : > { %3346 = vrcp.f32 %v836_v12 }
 0x5b0   : > { %3348 = vrcp.f32 %v1003_v9 }
 0x5b1   : > { %3350 = vrcp.f32 %v1170_v13  ;;  %v2869_v13 = vld [vmem:[%s4065_s6] ss:$0 sm:$0xff] }
 0x5b2   : > { %v1174_v19 = vpop.permute.xlu1 %1173 }
 0x5b9   : > { %v3347_v14 = vpop.eup %3346 }
 0x5ba   : > { %v838_v15 = vmul.f32 %v3347_v14, %v3345_v5  ;;  %v3349_v16 = vpop.eup %3348 }
 0x5bb   : > { %v1005_v11 = vmul.f32 %v3349_v16, %v3341_v59  ;;  %v3351_v18 = vpop.eup %3350  ;;  %v1472_v59 = vld [vmem:[%s4068_s9 + $0x20] sm:$0xff]  ;;  %v1474_v16 = vld [vmem:[%s4068_s9 + $0x30] sm:$0xff] }
 0x5bc   : > { %3048 = vmatmul.mubr.msk.f32.vlgmr.msra.gmra.mrb[6].mxu1 %vm584_vm2, %v838_v15  ;;  %v1172_v20 = vmul.f32 %v3351_v18, %v3343_v0  ;;  %v3239_v61 = vpack.c.bf16 %v1473_v60, %v1472_v59  ;;  %v2870_v18 = vld [vmem:[%s4067_s8] ss:$0 sm:$0xff] }
 0x5bd   : > { %3056 = vmatpush3.msra.mxu1 %v1007_v17  ;;  %3057 = vmatprep.mubr.msk.f32.mxu1 %vm3441_vm0, %v3442_v6  ;;  %v1475_v17 = vld [vmem:[%s4068_s9 + $0x38] sm:$0xff] }
 0x5be   : > { %3065 = vmatprep.subr.mxu1 %v3442_v6 }
 0x5c0   : > { %3058 = vmatmul.mubr.msk.f32.vlgmr.msra.gmra.mrb[8].mxu1 %vm584_vm2, %v1005_v11  ;;  %v3242_v11 = vpack.c.bf16 %v1475_v17, %v1474_v16 }
 0x5c1   : > { %3066 = vmatpush3.msra.mxu1 %v1174_v19  ;;  %3067 = vmatprep.mubr.msk.f32.mxu1 %vm3441_vm0, %v3442_v6 }
 0x5c2   : > { %3226 = vmatprep.subr.bf16.mxu1 %v3440_v3 }
 0x5c4   : > { %3068 = vmatmul.mubr.msk.f32.vlgmr.msra.gmra.mrb[10].mxu1 %vm584_vm2, %v1172_v20 }
 0x5c5   : > { %3089 = vmatprep.mubr.msk.f32.mxu1 %vm3441_vm0, %v3442_v6  ;;  %3228 = vmatpush3.bf16.msra.mxu1 %v3227_v50 }
 0x5c6   : > { %3229 = vmatprep.subr.bf16.mxu1 %v3440_v3 }
 0x68f   : > { %v911_v28 = vpop.f32.mrb[6].mxu1 }
 0x690   : > { %1250 = vrot.lane.b32.xlu1 %v911_v28, %s4089_s20  ;;  %v3049_v29 = vpop.f32.mrb[7].mxu1  ;;  %s4107_s20 = smov 80  }
 0x693   : > { %v1078_v30 = vpop.f32.mrb[8].mxu1 }
 0x694   : > { %1254 = vrot.lane.b32.xlu0 %v1078_v30, %s4088_s26  ;;  %v3059_v31 = vpop.f32.mrb[9].mxu1  ;;  %s4108_s26 = smov 72  }
 0x697   : > { %v1245_v32 = vpop.f32.mrb[10].mxu1 }
 0x698   : > { %1258 = vrot.lane.b32.xlu1 %v1245_v32, %s4087_s17  ;;  %v3069_v33 = vpop.f32.mrb[11].mxu1  ;;  %v2876_v32 = vld [vmem:[%s4097_s1 + $0x20] sm:$0xff]  ;;  %s4102_s17 = smov 88  }
 0x699   : > { %v2877_v33 = vld [vmem:[%s4097_s1 + $0x28] sm:$0xff] }
 0x702   : > { %v1251_v34 = vpop.permute.xlu1 %1250 }
 0x703   : > { %v1261_v36 = vsel %vm584_vm2, %v3674_v45, %v1251_v34  ;;  %v3245_v34 = vpack.c.bf16 %v2877_v33, %v2876_v32 }
 0x706   : > { %v1255_v35 = vpop.permute.xlu0 %1254 }
 0x707   : > { %v1263_v37 = vsel %vm1262_vm4, %v1261_v36, %v1255_v35  ;;  %v2878_v35 = vld [vmem:[%s4097_s1 + $0x30] sm:$0xff]  ;;  %v2879_v36 = vld [vmem:[%s4097_s1 + $0x38] sm:$0xff] }
 0x70a   : > { %v1259_v38 = vpop.permute.xlu1 %1258 }
 0x70b   : > { %v1265_v39 = vsel %vm1264_vm5, %v1263_v37, %v1259_v38  ;;  %v3248_v37 = vpack.c.bf16 %v2879_v36, %v2878_v35 }
 0x70c   : > { %3079 = vmatmul.mubr.msk.f32.vlgmr.msra.gmra.mrb[6].mxu0 %vm507_vm1, %v1265_v39 }
 0x70d   : > { %3108 = vmatprep.mubr.msk.f32.mxu0 %vm3441_vm0, %v3442_v6  ;;  %3234 = vmatpush3.bf16.msra.mxu0 %v3233_v56 }
 0x70e   : > { %3235 = vmatprep.subr.bf16.mxu0 %v3440_v3 }
 0x711   : > { %3237 = vmatpush3.bf16.msra.mxu0 %v3236_v58 }
 0x712   : > { %3238 = vmatprep.subr.bf16.mxu0 %v3440_v3 }
 0x715   : > { %3240 = vmatpush3.bf16.msra.mxu0 %v3239_v61 }
 0x716   : > { %3241 = vmatprep.subr.bf16.mxu0 %v3440_v3 }
 0x719   : > { %3243 = vmatpush3.bf16.msra.mxu0 %v3242_v11 }
 0x71a   : > { %3132 = vmatprep.subr.mxu0 %v3442_v6 }
 0x7df   : > { %v1346_v41 = vpop.f32.mrb[6].mxu0 }
 0x7e0   : > { %v1347_v42 = vadd.f32 %v2866_v40, %v1346_v41  ;;  %v3080_v43 = vpop.f32.mrb[7].mxu0 }
 0x7e2   : > { %v1350_v44 = vadd.f32 %v1347_v42, %v3610_v8  ;;  %v1385_v8 = vld [vmem:[%s4066_s7 + $0x10] sm:$0xff] }
 0x7e3   : > { %v3230_v52 = vpack.c.bf16 %v1386_v51, %v1385_v8  ;;  %v2881_v51 = vld [vmem:[%s4099_s2 + $0x1] ss:$0 sm:$0xff] }
 0x7e4   : > { %v1353_v45 = vsel %vm507_vm1, %v1350_v44, 0.0  ;;  %v1358_v46 = vmul.f32 %v1350_v44, %v1350_v44 }
 0x7e5   : > { %1354 = vadd.xlane.f32.xlu0 %v1353_v45  ;;  %3231 = vmatpush3.bf16.msra.mxu1 %v3230_v52 }
 0x7e6   : > { %v1359_v47 = vsel %vm507_vm1, %v1358_v46, 0.0  ;;  %3244 = vmatprep.subr.bf16.mxu1 %v3440_v3 }
 0x7e7   : > { %1360 = vadd.xlane.f32.xlu1 %v1359_v47  ;;  %v2874_v47 = vld [vmem:[%s4070_s11] ss:$0 sm:$0xff] }
 0x872   : > { %v1355_v62 = vpop.xlane.xlu0 %1354 }
 0x873   : > { %v1357_v63 = vmul.f32 0.03125, %v1355_v62 }
 0x874   : > { %v1361_v0 = vpop.xlane.xlu1 %1360 }
 0x875   : > { %v1363_v1 = vmul.f32 %v1357_v63, %v1357_v63  ;;  %v1362_v2 = vmul.f32 0.03125, %v1361_v0  ;;  %v1365_v7 = vsub.f32 %v1350_v44, %v1357_v63 }
 0x877   : > { %v1364_v4 = vsub.f32 %v1362_v2, %v1363_v1 }
 0x879   : > { %v1366_v5 = vadd.f32 1e-05, %v1364_v4 }
 0x87b   : > { %3352 = vrsqrt.f32 %v1366_v5 }
 0x885   : > { %v3353_v9 = vpop.eup %3352 }
 0x886   : > { %v1368_v12 = vmul.f32 %v3353_v9, %v1365_v7 }
 0x888   : > { %v1375_v14 = vmul.f32 %v2868_v10, %v1368_v12 }
 0x88a   : > { %v1382_v15 = vadd.f32 %v2869_v13, %v1375_v14 }
 0x88c   : > { %3090 = vmatmul.mubr.msk.f32.vlgmr.msra.gmra.mrb[12].mxu1 %vm507_vm1, %v1382_v15 }
 0x88d   : > { %3119 = vmatprep.mubr.msk.f32.mxu1 %vm3441_vm0, %v3442_v6  ;;  %3246 = vmatpush3.bf16.msra.mxu1 %v3245_v34 }
 0x88e   : > { %3247 = vmatprep.subr.bf16.mxu1 %v3440_v3 }
 0x891   : > { %3249 = vmatpush3.bf16.msra.mxu1 %v3248_v37 }
 0x892   : > { %3122 = vmatprep.subr.mxu1 %v3442_v6 }
 0x95f   : > { %v1463_v19 = vpop.f32.mrb[12].mxu1 }
 0x960   : > { %v1464_v20 = vadd.f32 %v2870_v18, %v1463_v19  ;;  %v3091_v21 = vpop.f32.mrb[13].mxu1 }
 0x962   : > { %v1467_v23 = vmax.f32 %v1464_v20, 0.0 }
 0x964   : > { %3109 = vmatmul.mubr.msk.f32.vlgmr.msra.gmra.mrb[8].mxu0 %vm1483_vm6, %v1467_v23 }
 0x965   : > { %3134 = vmatprep.mubr.msk.f32.mxu0 %vm3441_vm0, %v3442_v6 }
 0xa37   : > { %v1553_v25 = vpop.f32.mrb[8].mxu0 }
 0xa38   : > { %v1554_v26 = vadd.f32 %v2872_v24, %v1553_v25  ;;  %v3110_v27 = vpop.f32.mrb[9].mxu0 }
 0xa3a   : > { %v1557_v28 = vadd.f32 %v1554_v26, %v1382_v15 }
 0xa3c   : > { %v1560_v29 = vsel %vm507_vm1, %v1557_v28, 0.0  ;;  %v1564_v30 = vmul.f32 %v1557_v28, %v1557_v28 }
 0xa3d   : > { %1561 = vadd.xlane.f32.xlu0 %v1560_v29 }
 0xa3e   : > { %v1565_v31 = vsel %vm507_vm1, %v1564_v30, 0.0 }
 0xa41   : > { %1566 = vadd.xlane.f32.xlu0 %v1565_v31 }
 0xaca   : > { %v1562_v38 = vpop.xlane.xlu0 %1561 }
 0xacb   : > { %v1563_v39 = vmul.f32 0.03125, %v1562_v38 }
 0xacd   : > { %v1569_v41 = vmul.f32 %v1563_v39, %v1563_v39  ;;  %v1571_v45 = vsub.f32 %v1557_v28, %v1563_v39 }
 0xace   : > { %v1567_v40 = vpop.xlane.xlu0 %1566 }
 0xacf   : > { %v1568_v42 = vmul.f32 0.03125, %v1567_v40 }
 0xad1   : > { %v1570_v43 = vsub.f32 %v1568_v42, %v1569_v41 }
 0xad3   : > { %v1572_v44 = vadd.f32 1e-05, %v1570_v43 }
 0xad5   : > { %3354 = vrsqrt.f32 %v1572_v44 }
 0xadf   : > { %v3355_v46 = vpop.eup %3354 }
 0xae0   : > { %v1574_v48 = vmul.f32 %v3355_v46, %v1571_v45 }
 0xae2   : > { %v1581_v50 = vmul.f32 %v2874_v47, %v1574_v48 }
 0xae4   : > { %v3815_v8 = vadd.f32 %v2875_v49, %v1581_v50 }
 0xae6   : > { %3120 = vmatmul.mubr.msk.f32.vlgmr.msra.gmra.mrb[14].mxu1 %vm507_vm1, %v3815_v8 }
 0xae7   : > { %3124 = vmatprep.mubr.msk.f32.mxu1 %vm3441_vm0, %v3442_v6 }
 0xbb9   : > { %v1671_v52 = vpop.f32.mrb[14].mxu1 }
 0xbba   : > { %v3824_v53 = vadd.f32 %v2881_v51, %v1671_v52  ;;  %v3121_v54 = vpop.f32.mrb[15].mxu1 }
 0xbbc   : > { %1843 = vrot.lane.b32.xlu0 %v3824_v53, %s4102_s17  ;;  %1676 = vrot.lane.b32.xlu1 %v3824_v53, %s4103_s0  ;;  %s4111_s17 = smov 48   ;;  %s4112_s0 = smov 40  }
 0xbc0   : > { %2008 = vrot.lane.b32.xlu0 %v3824_v53, %s4104_s25  ;;  %1841 = vrot.lane.b32.xlu1 %v3824_v53, %s4105_s30  ;;  %s4114_s25 = smov 16   ;;  %s4115_s30 = smov 24  }
 0xbc4   : > { %2175 = vrot.lane.b32.xlu0 %v3824_v53, %s4106_s16  ;;  %2010 = vrot.lane.b32.xlu1 %v3824_v53, %s4107_s20  ;;  %s483_s20 = sand.u32 1, %s3430_s19  }
 0xbc5   : > { %s2774_s2 = scalar_lea.sflag [#allocation3], %s483_s20 }
 0xbc8   : > { %2177 = vrot.lane.b32.xlu1 %v3824_v53, %s4108_s26  ;;  %s4113_s26 = smov 8  }
 0xc2e   : > { %v1844_v55 = vpop.permute.xlu0 %1843  ;;  %v1677_v56 = vpop.permute.xlu1 %1676 }
 0xc2f   : > { %3123 = vmatpush3.xpose.msk.msra.mxu1 %vm584_vm2, %v1677_v56  ;;  %3133 = vmatpush3.xpose.msk.msra.mxu0 %vm584_vm2, %v1844_v55 }
 0xc30   : > { %3142 = vmatprep.subr.mxu0 %v3442_v6  ;;  %3127 = vmatprep.subr.mxu1 %v3442_v6 }
 0xc32   : > { %3125 = vmatmul.mubr.msk.f32.vlgmr.msra.gmra.mrb[16].mxu1 %vm584_vm2, %v3824_v53  ;;  %v1842_v57 = vpop.permute.xlu1 %1841  ;;  %v2009_v59 = vpop.permute.xlu0 %2008 }
 0xc33   : > { %3135 = vmatmul.mubr.msk.f32.vlgmr.msra.gmra.mrb[10].mxu0 %vm584_vm2, %v1842_v57  ;;  %3129 = vmatprep.mubr.msk.f32.mxu1 %vm3441_vm0, %v3442_v6  ;;  %v2895_v57 = vld [vmem:[%s4062_s3 + $0x20] sm:$0xff] }
 0xc34   : > { %3144 = vmatprep.mubr.msk.f32.mxu0 %vm3441_vm0, %v3442_v6 }
 0xc36   : > { %v2011_v58 = vpop.permute.xlu1 %2010  ;;  %v2176_v61 = vpop.permute.xlu0 %2175 }
 0xc37   : > { %3143 = vmatpush3.xpose.msk.msra.mxu0 %vm584_vm2, %v2011_v58  ;;  %v2896_v58 = vld [vmem:[%s4062_s3 + $0x28] sm:$0xff] }
 0xc38   : > { %3152 = vmatprep.subr.mxu0 %v3442_v6 }
 0xc3a   : > { %3145 = vmatmul.mubr.msk.f32.vlgmr.msra.gmra.mrb[12].mxu0 %vm584_vm2, %v2009_v59  ;;  %v2178_v60 = vpop.permute.xlu1 %2177  ;;  %v3251_v59 = vpack.c.bf16 %v2896_v58, %v2895_v57 }
 0xc3b   : > { %3153 = vmatpush3.xpose.msk.msra.mxu0 %vm584_vm2, %v2178_v60  ;;  %3154 = vmatprep.mubr.msk.f32.mxu0 %vm3441_vm0, %v3442_v6 }
 0xc3c   : > { %3250 = vmatprep.subr.bf16.mxu0 %v3440_v3 }
 0xc3e   : > { %3155 = vmatmul.mubr.msk.f32.vlgmr.msra.gmra.mrb[14].mxu0 %vm584_vm2, %v2176_v61 }
 0xc3f   : > { %3170 = vmatprep.mubr.msk.f32.mxu0 %vm3441_vm0, %v3442_v6  ;;  %3252 = vmatpush3.bf16.msra.mxu0 %v3251_v59 }
 0xc40   : > { %3253 = vmatprep.subr.bf16.mxu0 %v3440_v3 }
 0xd05   : > { %v1748_v62 = vpop.f32.mrb[16].mxu1 }
 0xd06   : > { %v1752_v63 = vmul.f32 0.35355338, %v1748_v62  ;;  %v3126_v0 = vpop.f32.mrb[17].mxu1  ;;  %v1915_v1 = vpop.f32.mrb[10].mxu0 }
 0xd07   : > { %v1919_v2 = vmul.f32 0.35355338, %v1915_v1  ;;  %v3136_v4 = vpop.f32.mrb[11].mxu0  ;;  %v2897_v0 = vld [vmem:[%s4062_s3 + $0x30] sm:$0xff]  ;;  %v2898_v1 = vld [vmem:[%s4062_s3 + $0x38] sm:$0xff] }
 0xd08   : > { %v1753_v5 = vsel %vm3641_vm3, %v1752_v63, -1e+30 }
 0xd09   : > { %v1754_v7 = vsel %vm584_vm2, %v1753_v5, -inf  ;;  %v1920_v9 = vsel %vm3641_vm3, %v1919_v2, -1e+30  ;;  %v3254_v2 = vpack.c.bf16 %v2898_v1, %v2897_v0 }
 0xd0a   : > { %1755 = vmax.xlane.f32.xlu1 %v1754_v7  ;;  %v1921_v10 = vsel %vm584_vm2, %v1920_v9, -inf }
 0xd0b   : > { %1922 = vmax.xlane.f32.xlu0 %v1921_v10  ;;  %3255 = vmatpush3.bf16.msra.mxu0 %v3254_v2 }
 0xd0c   : > { %3262 = vmatprep.subr.bf16.mxu0 %v3440_v3 }
 0xd0d   : > { %v2082_v12 = vpop.f32.mrb[12].mxu0 }
 0xd0e   : > { %v2086_v13 = vmul.f32 0.35355338, %v2082_v12  ;;  %v3146_v14 = vpop.f32.mrb[13].mxu0 }
 0xd10   : > { %v2087_v15 = vsel %vm3641_vm3, %v2086_v13, -1e+30 }
 0xd11   : > { %v2249_v16 = vpop.f32.mrb[14].mxu0  ;;  %v2088_v17 = vsel %vm584_vm2, %v2087_v15, -inf }
 0xd12   : > { %v2253_v11 = vmul.f32 0.35355338, %v2249_v16  ;;  %2089 = vmax.xlane.f32.xlu0 %v2088_v17  ;;  %v3156_v18 = vpop.f32.mrb[15].mxu0  ;;  %v2900_v17 = vld [vmem:[%s4063_s4 + $0x1] ss:$0 sm:$0xff] }
 0xd14   : > { %v2254_v19 = vsel %vm3641_vm3, %v2253_v11, -1e+30 }
 0xd15   : > { %v2255_v20 = vsel %vm584_vm2, %v2254_v19, -inf }
 0xd16   : > { %2256 = vmax.xlane.f32.xlu1 %v2255_v20 }
 0xd27   : > { %1932 = vrot.lane.b32.xlu1 %v3824_v53, %s4109_s27 }
 0xd97   : > { %v1756_v21 = vpop.xlane.xlu1 %1755 }
 0xd98   : > { %v1757_v23 = vsub.f32 %v1753_v5, %v1756_v21  ;;  %v1923_v24 = vpop.xlane.xlu0 %1922 }
 0xd99   : > { %v1924_v25 = vsub.f32 %v1920_v9, %v1923_v24 }
 0xd9a   : > { %v1758_v26 = vmul.f32 1.442695, %v1757_v23 }
 0xd9b   : > { %v1925_v27 = vmul.f32 1.442695, %v1924_v25  ;;  %v2906_v25 = vld [vmem:[%s4066_s7 + $0x20] sm:$0xff] }
 0xd9c   : > { %3356 = vpow2.f32 %v1758_v26  ;;  %v2907_v26 = vld [vmem:[%s4066_s7 + $0x28] sm:$0xff] }
 0xd9d   : > { %3358 = vpow2.f32 %v1925_v27  ;;  %v3257_v27 = vpack.c.bf16 %v2907_v26, %v2906_v25  ;;  %v2928_v26 = vld [vmem:[%s4073_s14] ss:$0 sm:$0xff] }
 0xd9f   : > { %v2090_v36 = vpop.xlane.xlu0 %2089 }
 0xda0   : > { %v2091_v37 = vsub.f32 %v2087_v15, %v2090_v36  ;;  %v2918_v36 = vld [vmem:[%s4068_s9 + $0x68] sm:$0xff] }
 0xda2   : > { %v2092_v38 = vmul.f32 1.442695, %v2091_v37 }
 0xda3   : > { %v2257_v28 = vpop.xlane.xlu1 %2256 }
 0xda4   : > { %v2258_v29 = vsub.f32 %v2254_v19, %v2257_v28  ;;  %v2909_v28 = vld [vmem:[%s4066_s7 + $0x38] sm:$0xff] }
 0xda6   : > { %v3357_v30 = vpop.eup %3356  ;;  %v2259_v31 = vmul.f32 1.442695, %v2258_v29 }
 0xda7   : > { %v3359_v22 = vpop.eup %3358  ;;  %v1760_v32 = vsel %vm584_vm2, %v3357_v30, 0.0  ;;  %v1933_v41 = vpop.permute.xlu1 %1932 }
 0xda8   : > { %3360 = vpow2.f32 %v2259_v31  ;;  %1761 = vadd.xlane.f32.xlu0 %v1760_v32  ;;  %v1927_v33 = vsel %vm584_vm2, %v3359_v22, 0.0  ;;  %v2914_v31 = vld [vmem:[%s4068_s9 + $0x48] sm:$0xff] }
 0xda9   : > { %1928 = vadd.xlane.f32.xlu1 %v1927_v33  ;;  %3362 = vpow2.f32 %v2092_v38  ;;  %v2916_v33 = vld [vmem:[%s4068_s9 + $0x58] sm:$0xff] }
 0xdb2   : > { %v3361_v34 = vpop.eup %3360 }
 0xdb3   : > { %v2261_v35 = vsel %vm584_vm2, %v3361_v34, 0.0  ;;  %v3363_v39 = vpop.eup %3362 }
 0xdb4   : > { %2262 = vadd.xlane.f32.xlu1 %v2261_v35  ;;  %v2094_v40 = vsel %vm584_vm2, %v3363_v39, 0.0  ;;  %v2917_v35 = vld [vmem:[%s4068_s9 + $0x60] sm:$0xff] }
 0xdb5   : > { %v3269_v37 = vpack.c.bf16 %v2918_v36, %v2917_v35 }
 0xdbe   : > { %1765 = vrot.lane.b32.xlu0 %v3824_v53, %s4110_s23 }
 0xdc5   : > { %2099 = vrot.lane.b32.xlu1 %v3824_v53, %s4111_s17  ;;  %s2931_s17 = sshll.u32 %s3559_s22, 7  ;;  %s3457_s22 = smov [#allocation2]  }
 0xdc6   : > { %s4017_s16 = scalar_lea.hbm %s4074_s15, %s2931_s17 }
 0xddd   : > { %2095 = vadd.xlane.f32.xlu0 %v2094_v40 }
 0xdf3   : > { %2266 = vrot.lane.b32.xlu0 %v3824_v53, %s4112_s0 }
 0xe35   : > { %v1762_v42 = vpop.xlane.xlu0 %1761 }
 0xe36   : > { %3364 = vrcp.f32 %v1762_v42  ;;  %v1929_v43 = vpop.xlane.xlu1 %1928 }
 0xe37   : > { %3366 = vrcp.f32 %v1929_v43 }
 0xe39   : > { %v1766_v44 = vpop.permute.xlu0 %1765 }
 0xe3a   : > { %3128 = vmatpush3.msra.mxu1 %v1766_v44 }
 0xe3b   : > { %3137 = vmatprep.subr.mxu1 %v3442_v6 }
 0xe40   : > { %v3365_v45 = vpop.eup %3364 }
 0xe41   : > { %v1764_v46 = vmul.f32 %v3365_v45, %v3357_v30  ;;  %v2263_v47 = vpop.xlane.xlu1 %2262  ;;  %v3367_v48 = vpop.eup %3366  ;;  %v2913_v30 = vld [vmem:[%s4068_s9 + $0x40] sm:$0xff] }
 0xe42   : > { %v1931_v49 = vmul.f32 %v3367_v48, %v3359_v22  ;;  %v2915_v22 = vld [vmem:[%s4068_s9 + $0x50] sm:$0xff]  ;;  %v3263_v32 = vpack.c.bf16 %v2914_v31, %v2913_v30 }
 0xe43   : > { %3130 = vmatmul.mubr.msk.f32.vlgmr.msra.gmra.mrb[18].mxu1 %vm584_vm2, %v1764_v46 }
 0xe44   : > { %3138 = vmatpush3.msra.mxu1 %v1933_v41  ;;  %3139 = vmatprep.mubr.msk.f32.mxu1 %vm3441_vm0, %v3442_v6 }
 0xe45   : > { %v2100_v50 = vpop.permute.xlu1 %2099  ;;  %3147 = vmatprep.subr.mxu1 %v3442_v6 }
 0xe47   : > { %3140 = vmatmul.mubr.msk.f32.vlgmr.msra.gmra.mrb[20].mxu1 %vm584_vm2, %v1931_v49  ;;  %v2905_v49 = vld [vmem:[%s4065_s6 + $0x1] ss:$0 sm:$0xff] }
 0xe48   : > { %3148 = vmatpush3.msra.mxu1 %v2100_v50  ;;  %3149 = vmatprep.mubr.msk.f32.mxu1 %vm3441_vm0, %v3442_v6 }
 0xe49   : > { %3157 = vmatprep.subr.mxu1 %v3442_v6 }
 0xe6a   : > { %v2096_v51 = vpop.xlane.xlu0 %2095 }
 0xe6b   : > { %3368 = vrcp.f32 %v2096_v51 }
 0xe6c   : > { %3370 = vrcp.f32 %v2263_v47  ;;  %v2904_v47 = vld [vmem:[%s4064_s5 + $0x1] ss:$0 sm:$0xff] }
 0xe6e   : > { %v2267_v55 = vpop.permute.xlu0 %2266 }
 0xe75   : > { %v3369_v52 = vpop.eup %3368 }
 0xe76   : > { %v2098_v53 = vmul.f32 %v3369_v52, %v3363_v39  ;;  %v3371_v54 = vpop.eup %3370  ;;  %v2919_v52 = vld [vmem:[%s4068_s9 + $0x70] sm:$0xff] }
 0xe77   : > { %v2265_v56 = vmul.f32 %v3371_v54, %v3361_v34  ;;  %v3266_v34 = vpack.c.bf16 %v2916_v33, %v2915_v22 }
 0xe78   : > { %3150 = vmatmul.mubr.msk.f32.vlgmr.msra.gmra.mrb[22].mxu1 %vm584_vm2, %v2098_v53  ;;  %v2920_v53 = vld [vmem:[%s4068_s9 + $0x78] sm:$0xff] }
 0xe79   : > { %3158 = vmatpush3.msra.mxu1 %v2267_v55  ;;  %3159 = vmatprep.mubr.msk.f32.mxu1 %vm3441_vm0, %v3442_v6  ;;  %v3272_v54 = vpack.c.bf16 %v2920_v53, %v2919_v52  ;;  %v2911_v55 = vld [vmem:[%s4067_s8 + $0x1] ss:$0 sm:$0xff] }
 0xe7a   : > { %3256 = vmatprep.subr.bf16.mxu1 %v3440_v3 }
 0xe7c   : > { %3160 = vmatmul.mubr.msk.f32.vlgmr.msra.gmra.mrb[24].mxu1 %vm584_vm2, %v2265_v56 }
 0xe7d   : > { %3181 = vmatprep.mubr.msk.f32.mxu1 %vm3441_vm0, %v3442_v6  ;;  %3258 = vmatpush3.bf16.msra.mxu1 %v3257_v27 }
 0xe7e   : > { %3259 = vmatprep.subr.bf16.mxu1 %v3440_v3 }
 0xf16   : > { %v1837_v60 = vpop.f32.mrb[18].mxu1 }
 0xf17   : > { %v3131_v61 = vpop.f32.mrb[19].mxu1 }
 0xf1a   : > { %v2004_v62 = vpop.f32.mrb[20].mxu1 }
 0xf1b   : > { %2343 = vrot.lane.b32.xlu1 %v2004_v62, %s4113_s26  ;;  %v3141_v63 = vpop.f32.mrb[21].mxu1  ;;  %s2850_s26 = sshll.u32 %s483_s20, 3 }
 0xf1c   : > { %s485_s1 = scalar_lea.vmem [#allocation2], %s2850_s26  ;;  %s3380_s26 = sshll.u32 %s3457_s22, 4  ;;  %s3381_s26 = int_to_ptr.vmem [resolvable:$false] %s3380_s26 }
 0xf1d   : > { %s2787_s0 = sshll.u32 %s485_s1, 4  ;;  %s3382_s23 = scalar_lea.vmem %s3381_s26, 256  ;;  %s4019_s0 = int_to_ptr.vmem [resolvable:$true] %s2787_s0 }
 0xf1e   : > { %s3376_s27 = scalar_lea.vmem %s4019_s0, 128  ;;  %p3383_p0 = scmp.lt.s32.totalorder %s4019_s0, %s3381_s26 }
 0xf1f   : > { %p3377_p11 = scmp.ne.s32.totalorder %s4019_s0, %s3376_s27  ;;  %p3384_p1 = scmp.lt.s32.totalorder %s3382_s23, %s3376_s27 }
 0xf21   : > { %p3378_p12 = pnand %p3377_p11, %p3576_p5  ;;  %p3385_p2 = por %p3384_p1, %p3383_p0 }
 0xf23   : > { %p3379_p13 = pneg %p3378_p12 }
 0xf25   : > { %p3386_p3 = pnand %p3385_p2, %p3379_p13 }
 0xf4b   : > { %v2171_v4 = vpop.f32.mrb[22].mxu1 }
 0xf4c   : > { %2347 = vrot.lane.b32.xlu0 %v2171_v4, %s4114_s25  ;;  %v3151_v5 = vpop.f32.mrb[23].mxu1  ;;  %v2688_v4 = vld [vmem:[%s4072_s13] sm:$0xff] }
 0xf4d   : > { %v2689_v5 = vld [vmem:[%s4072_s13 + $0x8] sm:$0xff] }
 0xf4f   : > { %v2338_v7 = vpop.f32.mrb[24].mxu1 }
 0xf50   : > { %2351 = vrot.lane.b32.xlu1 %v2338_v7, %s4115_s30  ;;  %v3161_v9 = vpop.f32.mrb[25].mxu1  ;;  %v3275_v7 = vpack.c.bf16 %v2689_v5, %v2688_v4 }
 0xf51   : > { %v2690_v9 = vld [vmem:[%s4072_s13 + $0x10] sm:$0xff] }
 0xf8d   : > { %v2344_v10 = vpop.permute.xlu1 %2343 }
 0xf8e   : > { %v2354_v13 = vsel %vm584_vm2, %v1837_v60, %v2344_v10  ;;  %v2691_v10 = vld [vmem:[%s4072_s13 + $0x18] sm:$0xff] }
 0xfbe   : > { %v2348_v12 = vpop.permute.xlu0 %2347 }
 0xfbf   : > { %v2355_v14 = vsel %vm1262_vm4, %v2354_v13, %v2348_v12  ;;  %v3278_v12 = vpack.c.bf16 %v2691_v10, %v2690_v9 }
 0xfc2   : > { %v2352_v15 = vpop.permute.xlu1 %2351 }
 0xfc3   : > { %v2356_v16 = vsel %vm1264_vm5, %v2355_v14, %v2352_v15 }
 0xfc4   : > { %3171 = vmatmul.mubr.msk.f32.vlgmr.msra.gmra.mrb[16].mxu0 %vm507_vm1, %v2356_v16 }
 0xfc5   : > { %3200 = vmatprep.mubr.msk.f32.mxu0 %vm3441_vm0, %v3442_v6  ;;  %3264 = vmatpush3.bf16.msra.mxu0 %v3263_v32 }
 0xfc6   : > { %3265 = vmatprep.subr.bf16.mxu0 %v3440_v3 }
 0xfc9   : > { %3267 = vmatpush3.bf16.msra.mxu0 %v3266_v34 }
 0xfca   : > { %3268 = vmatprep.subr.bf16.mxu0 %v3440_v3 }
 0xfcd   : > { %3270 = vmatpush3.bf16.msra.mxu0 %v3269_v37 }
 0xfce   : > { %3271 = vmatprep.subr.bf16.mxu0 %v3440_v3 }
 0xfd1   : > { %3273 = vmatpush3.bf16.msra.mxu0 %v3272_v54 }
0x1097   : > { %v2439_v11 = vpop.f32.mrb[16].mxu0 }
0x1098   : > { %v2440_v18 = vadd.f32 %v2900_v17, %v2439_v11  ;;  %v3172_v19 = vpop.f32.mrb[17].mxu0 }
0x109a   : > { %v2443_v20 = vadd.f32 %v2440_v18, %v3815_v8  ;;  %v2908_v8 = vld [vmem:[%s4066_s7 + $0x30] sm:$0xff] }
0x109b   : > { %v3260_v29 = vpack.c.bf16 %v2909_v28, %v2908_v8 }
0x109c   : > { %v2448_v21 = vsel %vm507_vm1, %v2443_v20, 0.0  ;;  %v2452_v23 = vmul.f32 %v2443_v20, %v2443_v20 }
0x109d   : > { %2449 = vadd.xlane.f32.xlu0 %v2448_v21  ;;  %3261 = vmatpush3.bf16.msra.mxu1 %v3260_v29  ;;  %v2926_v21 = vld [vmem:[%s4070_s11 + $0x1] ss:$0 sm:$0xff] }
0x109e   : > { %v2453_v24 = vsel %vm507_vm1, %v2452_v23, 0.0  ;;  %3274 = vmatprep.subr.bf16.mxu1 %v3440_v3 }
0x109f   : > { %2454 = vadd.xlane.f32.xlu1 %v2453_v24 }
0x112a   : > { %v2450_v38 = vpop.xlane.xlu0 %2449 }
0x112b   : > { %v2451_v39 = vmul.f32 0.03125, %v2450_v38 }
0x112c   : > { %v2455_v40 = vpop.xlane.xlu1 %2454 }
0x112d   : > { %v2457_v41 = vmul.f32 %v2451_v39, %v2451_v39  ;;  %v2456_v42 = vmul.f32 0.03125, %v2455_v40  ;;  %v2459_v45 = vsub.f32 %v2443_v20, %v2451_v39 }
0x112f   : > { %v2458_v43 = vsub.f32 %v2456_v42, %v2457_v41 }
0x1131   : > { %v2460_v44 = vadd.f32 1e-05, %v2458_v43 }
0x1133   : > { %3372 = vrsqrt.f32 %v2460_v44 }
0x113d   : > { %v3373_v46 = vpop.eup %3372 }
0x113e   : > { %v2462_v48 = vmul.f32 %v3373_v46, %v2459_v45 }
0x1140   : > { %v2469_v50 = vmul.f32 %v2904_v47, %v2462_v48 }
0x1142   : > { %v2476_v51 = vadd.f32 %v2905_v49, %v2469_v50 }
0x1144   : > { %3182 = vmatmul.mubr.msk.f32.vlgmr.msra.gmra.mrb[26].mxu1 %vm507_vm1, %v2476_v51 }
0x1145   : > { %3211 = vmatprep.mubr.msk.f32.mxu1 %vm3441_vm0, %v3442_v6  ;;  %v2922_v6 = vld [vmem:[%s4069_s10 + $0x1] ss:$0 sm:$0xff]  ;;  %3276 = vmatpush3.bf16.msra.mxu1 %v3275_v7 }
0x1146   : > { %3277 = vmatprep.subr.bf16.mxu1 %v3440_v3  ;;  %v2927_v3 = vld [vmem:[%s4071_s12 + $0x1] ss:$0 sm:$0xff] }
0x1149   : > { %3279 = vmatpush3.bf16.msra.mxu1 %v3278_v12 }
0x1217   : > { %v2559_v56 = vpop.f32.mrb[26].mxu1 }
0x1218   : > { %v2560_v57 = vadd.f32 %v2911_v55, %v2559_v56  ;;  %v3183_v58 = vpop.f32.mrb[27].mxu1 }
0x121a   : > { %v2563_v59 = vmax.f32 %v2560_v57, 0.0 }
0x121c   : > { %3201 = vmatmul.mubr.msk.f32.vlgmr.msra.gmra.mrb[18].mxu0 %vm1483_vm6, %v2563_v59 }
0x12ef   : > { %v2650_v60 = vpop.f32.mrb[18].mxu0 }
0x12f0   : > { %v2651_v61 = vadd.f32 %v2922_v6, %v2650_v60  ;;  %v3202_v62 = vpop.f32.mrb[19].mxu0 }
0x12f2   : > { %v2654_v63 = vadd.f32 %v2651_v61, %v2476_v51 }
0x12f4   : > { %v2659_v0 = vsel %vm507_vm1, %v2654_v63, 0.0  ;;  %v2663_v1 = vmul.f32 %v2654_v63, %v2654_v63 }
0x12f5   : > { %2660 = vadd.xlane.f32.xlu0 %v2659_v0 }
0x12f6   : > { %v2664_v2 = vsel %vm507_vm1, %v2663_v1, 0.0 }
0x12f9   : > { %2665 = vadd.xlane.f32.xlu0 %v2664_v2 }
0x1382   : > { %v2661_v13 = vpop.xlane.xlu0 %2660 }
0x1383   : > { %v2662_v14 = vmul.f32 0.03125, %v2661_v13 }
0x1385   : > { %v2668_v16 = vmul.f32 %v2662_v14, %v2662_v14  ;;  %v2670_v19 = vsub.f32 %v2654_v63, %v2662_v14 }
0x1386   : > { %v2666_v15 = vpop.xlane.xlu0 %2665 }
0x1387   : > { %v2667_v17 = vmul.f32 0.03125, %v2666_v15 }
0x1389   : > { %v2669_v11 = vsub.f32 %v2667_v17, %v2668_v16 }
0x138b   : > { %v2671_v18 = vadd.f32 1e-05, %v2669_v11 }
0x138d   : > { %3374 = vrsqrt.f32 %v2671_v18 }
0x1397   : > { %v3375_v20 = vpop.eup %3374 }
0x1398   : > { %v2673_v23 = vmul.f32 %v3375_v20, %v2670_v19 }
0x139a   : > { %v2680_v24 = vmul.f32 %v2926_v21, %v2673_v23 }
0x139c   : > { %v2687_v25 = vadd.f32 %v2927_v3, %v2680_v24 }
0x139e   : > { %3212 = vmatmul.mubr.msk.f32.vlgmr.msra.gmra.mrb[28].mxu1 %vm507_vm1, %v2687_v25 }
0x1471   : > { %v2768_v27 = vpop.f32.mrb[28].mxu1 }
0x1472   : > { %v2769_v8 = vadd.f32 %v2928_v26, %v2768_v27  ;;  %v3213_v28 = vpop.f32.mrb[29].mxu1 }
0x1474   : > { %2772 = vst [vmem:[%s485_s1] sm:$0xff] %v2769_v8 }
0x1475   : > { %3389 = shalt.err (!%p3386_p3)
}
0x1476   : > { %s3390_s1 = scalar_lea.hbm %s4017_s16, 128  ;;  %s3394_s25 = scalar_lea.hbm %s4074_s15, 256 }
0x1477   : > { %p3391_p4 = scmp.ne.s32.totalorder %s4017_s16, %s3390_s1  ;;  %p3395_p9 = scmp.lt.u32.totalorder %s4017_s16, %s4074_s15 }
0x1478   : > { %p3396_p10 = scmp.lt.u32.totalorder %s3394_s25, %s3390_s1  ;;  %p3398_p12 = scmp.lt.u32.totalorder %s3390_s1, %s4017_s16 }
0x1479   : > { %p3392_p7 = pnand %p3391_p4, %p3576_p5 }
0x147a   : > { %p3397_p11 = por %p3396_p10, %p3395_p9 }
0x147b   : > { %p3393_p8 = pneg %p3392_p7 }
0x147c   : > { %p3399_p13 = por %p3398_p12, %p3397_p11 }
0x147e   : > { %p3400_p0 = pnand %p3399_p13, %p3393_p8 }
0x1480   : > { %3403 = shalt.err (!%p3400_p0)
}
0x1481   : > { %3280 = dma.vmem_to_hbm [thread:$0]  (%p3576_p5), %s4019_s0, 128, %s4017_s16, %s2774_s2  }
0x1482 PF: > { %p3286_p1 = scmp.ge.s32.totalorder %s3438_s21, 2  ;;  %s2799_s27 = sand.u32 1, %s3426_s18  }
0x1483   : > { %s2800_s26 = scalar_lea.sflag [#allocation3], %s2799_s27 }
0x1484   : > { %p3283_p2 = pnand %p3286_p1, %p3580_p6 }
0x1486   : > { %3421 = dma.done.wait (!%p3283_p2), %s2800_s26, 128  }
0x1487   : > { %3423 = vsyncadd (!%p3283_p2), %s2800_s26, 4294967168  ;;  %s4116_s23 = sld [smem:[#allocation5_spill]]  ;;  %s4117_s20 = sld [smem:[#allocation6_spill]] }
0x1488   : > { %p25_p3 = scmp.ge.s32.totalorder %s3563_s24, 4   ;;  %s4118_s18 = smov %s3430_s19 }
0x1489   : > { %s4120_s21 = smov %s3563_s24 }
0x148a   :  { %27 = sbr.rel (!%p25_p3) target bundleno = 7 (0x7), region = 127 }
0x148d   : > { %s4119_s19 = smov %s4116_s23 }
0x1491   :  { %2805 = vsyncpa [#allocation3], 1 }
0x1492   :  { %2807 = vsyncpa [#allocation3 + $0x1], 1 }

</bundles_post_ra>
